<compile_context>
chip_gen: v6e
topology: v6e:2x2x1
jax: 0.10.0
libtpu: 0.0.40
codegen_flags: <defaults>
</compile_context>

<pallas_src>
import jax
import jax.numpy as jnp
from jax.experimental import pallas as pl
from jax.experimental.pallas import tpu as pltpu

DROPOUT_P = 0.2
LATENT = 20
LATENT_PAD = 128          # pad the 20-wide latent to one full lane group
DEFAULT_B_TILE = 512      # fits v5e's 16 MiB scoped-VMEM default with headroom


def _round_up(n, m):
    return ((n + m - 1) // m) * m


def _autoencoder_kernel(x_ref, drop_ref,
                        w1_ref, b1_ref, w2_ref, b2_ref, w3_ref, b3_ref,
                        w4_ref, b4_ref, w5_ref, b5_ref, w6_ref, b6_ref,
                        e_ref, d_ref):
    """One batch tile of the full encoder -> dropout -> decoder chain."""
    x = x_ref[...]                                                    # (T, 784) f32

    # ---------------- encoder (bf16 MXU inputs, f32 accumulate) ----------------
    h = jnp.dot(x.astype(jnp.bfloat16), w1_ref[...],
                preferred_element_type=jnp.float32) + b1_ref[...]
    h = jnp.maximum(h, 0.0)                                           # (T, 256)
    h = jnp.dot(h.astype(jnp.bfloat16), w2_ref[...],
                preferred_element_type=jnp.float32) + b2_ref[...]
    h = jnp.maximum(h, 0.0)                                           # (T, 64)
    e = jnp.dot(h.astype(jnp.bfloat16), w3_ref[...],
                preferred_element_type=jnp.float32) + b3_ref[...]
    e = jnp.maximum(e, 0.0)                                           # (T, 128) padded latent

    # ---------------- dropout(p=0.2), training mode ----------------
    # drop_ref holds keep_mask / (1 - p), precomputed in the wrapper.
    e = e * drop_ref[...]
    e_ref[...] = e          # PyTorch returns the post-dropout latent

    # ---------------- decoder ----------------
    h = jnp.dot(e.astype(jnp.bfloat16), w4_ref[...],
                preferred_element_type=jnp.float32) + b4_ref[...]
    h = jnp.maximum(h, 0.0)                                           # (T, 64)
    h = jnp.dot(h.astype(jnp.bfloat16), w5_ref[...],
                preferred_element_type=jnp.float32) + b5_ref[...]
    h = jnp.maximum(h, 0.0)                                           # (T, 256)
    d = jnp.dot(h.astype(jnp.bfloat16), w6_ref[...],
                preferred_element_type=jnp.float32) + b6_ref[...]
    d_ref[...] = jnp.maximum(d, 0.0)                                  # (T, 784)


def autoencoder_forward(x, params, dropout_key, *, train=True,
                        b_tile=DEFAULT_B_TILE):
    """x: (B, C, H, W) with C*H*W == 784.  Returns (e, d) like the torch module
    (e is the post-dropout 20-dim latent, d the 784-dim reconstruction)."""
    B = x.shape[0]
    x_flat = x.reshape(B, -1).astype(jnp.float32)                     # (B, 784)
    assert x_flat.shape[1] == 784

    (w1, b1, w2, b2, w3, b3, w4, b4, w5, b5, w6, b6) = params

    # Pad the 20-wide latent out to 128 lanes. The extra columns of w3/b3 are
    # zero, so ReLU gives exactly 0 there; the matching zero rows of w4
    # contribute nothing downstream, so semantics are unchanged.
    w3p = jnp.zeros((64, LATENT_PAD), jnp.float32).at[:, :LATENT].set(w3)
    b3p = jnp.zeros((1, LATENT_PAD), jnp.float32).at[:, :LATENT].set(b3)
    w4p = jnp.zeros((LATENT_PAD, 64), jnp.float32).at[:LATENT, :].set(w4)

    # bf16 weights (native MXU dtype, halves resident VMEM); keep biases f32.
    ws = [w.astype(jnp.bfloat16) for w in (w1, w2, w3p, w4p, w5, w6)]
    bs = [b.astype(jnp.float32) for b in (b1, b2, b3p, b4, b5, b6)]

    # Batch tiling: tile is a multiple of 8 (sublane) and divides padded B.
    tile = min(b_tile, _round_up(B, 8))
    B_pad = _round_up(B, tile)
    if B_pad != B:
        x_flat = jnp.pad(x_flat, ((0, B_pad - B), (0, 0)))
    n_tiles = B_pad // tile

    # Training-mode dropout multiplier (F.dropout default: training=True).
    if train:
        keep = jax.random.bernoulli(dropout_key, 1.0 - DROPOUT_P,
                                    (B_pad, LATENT_PAD))
        drop = keep.astype(jnp.float32) * (1.0 / (1.0 - DROPOUT_P))
    else:
        drop = jnp.ones((B_pad, LATENT_PAD), jnp.float32)

    def row_spec(ncols):
        return pl.BlockSpec((tile, ncols), lambda i: (i, 0))

    def const_spec(shape):
        return pl.BlockSpec(shape, lambda i: (0, 0))

    in_specs = [row_spec(784), row_spec(LATENT_PAD)]
    operands = [x_flat, drop]
    for w, b in zip(ws, bs):
        in_specs += [const_spec(w.shape), const_spec(b.shape)]
        operands += [w, b]

    flops = 2 * B_pad * (784 * 256 + 256 * 64 + 64 * LATENT_PAD
                         + LATENT_PAD * 64 + 64 * 256 + 256 * 784)
    bytes_accessed = (B_pad * (784 + LATENT_PAD + LATENT_PAD + 784) * 4
                      + sum(int(w.size) * 2 for w in ws)
                      + sum(int(b.size) * 4 for b in bs))

    e_pad, d_pad = pl.pallas_call(
        _autoencoder_kernel,
        grid=(n_tiles,),
        in_specs=in_specs,
        out_specs=(pl.BlockSpec((tile, LATENT_PAD), lambda i: (i, 0)),
                   pl.BlockSpec((tile, 784), lambda i: (i, 0))),
        out_shape=(jax.ShapeDtypeStruct((B_pad, LATENT_PAD), jnp.float32),
                   jax.ShapeDtypeStruct((B_pad, 784), jnp.float32)),
        compiler_params=pltpu.CompilerParams(
            dimension_semantics=("parallel",)),
        cost_estimate=pl.CostEstimate(flops=flops, transcendentals=0,
                                      bytes_accessed=bytes_accessed),
    )(*operands)

    return e_pad[:B, :LATENT], d_pad[:B]


def init_params(key):
    """Deterministic param init mirroring the nn.Linear shapes.
    Weights are stored transposed: (in_features, out_features)."""
    dims = [(784, 256), (256, 64), (64, 20), (20, 64), (64, 256), (256, 784)]
    params = []
    for i, (fan_in, fan_out) in enumerate(dims):
        kw, kb = jax.random.split(jax.random.fold_in(key, i))
        bound = 1.0 / (fan_in ** 0.5)   # same bound PyTorch uses for Linear
        w = jax.random.uniform(kw, (fan_in, fan_out), jnp.float32, -bound, bound)
        b = jax.random.uniform(kb, (1, fan_out), jnp.float32, -bound, bound)
        params += [w, b]
    return tuple(params)


if __name__ == "__main__":
    key = jax.random.PRNGKey(0)
    k_x, k_p, k_drop = jax.random.split(key, 3)

    # small MNIST-like batch: (B, C, H, W) = (2, 1, 28, 28) -> 784 flat features
    x = jax.random.normal(k_x, (2, 1, 28, 28), dtype=jnp.float32)
    params = init_params(k_p)

    e, d = autoencoder_forward(x, params, k_drop)
    jax.block_until_ready((e, d))

    assert e.shape == (2, 20) and d.shape == (2, 784)
    assert bool(jnp.all(e >= 0.0)) and bool(jnp.all(d >= 0.0))  # ReLU(-ish) outputs
    print("KERNEL_OK")
</pallas_src>

<mosaic_0001>
module attributes {stable_mosaic.version = 11 : i64} {
  func.func @_autoencoder_kernel(%arg0: i32, %arg1: memref<8x784xf32, #tpu.memory_space<vmem>>, %arg2: memref<8x128xf32, #tpu.memory_space<vmem>>, %arg3: memref<784x256xbf16, #tpu.memory_space<vmem>>, %arg4: memref<1x256xf32, #tpu.memory_space<vmem>>, %arg5: memref<256x64xbf16, #tpu.memory_space<vmem>>, %arg6: memref<1x64xf32, #tpu.memory_space<vmem>>, %arg7: memref<64x128xbf16, #tpu.memory_space<vmem>>, %arg8: memref<1x128xf32, #tpu.memory_space<vmem>>, %arg9: memref<128x64xbf16, #tpu.memory_space<vmem>>, %arg10: memref<1x64xf32, #tpu.memory_space<vmem>>, %arg11: memref<64x256xbf16, #tpu.memory_space<vmem>>, %arg12: memref<1x256xf32, #tpu.memory_space<vmem>>, %arg13: memref<256x784xbf16, #tpu.memory_space<vmem>>, %arg14: memref<1x784xf32, #tpu.memory_space<vmem>>, %arg15: memref<8x128xf32, #tpu.memory_space<vmem>>, %arg16: memref<8x784xf32, #tpu.memory_space<vmem>>) attributes {dimension_semantics = [#tpu.dimension_semantics<parallel>], iteration_bounds = array<i64: 1>, scalar_prefetch = 0 : i64, scratch_operands = 0 : i64, tpu.core_type = #tpu.core_type<tc>, window_params = [{transform_indices = @transform_0, window_bounds = array<i64: 8, 784>}, {transform_indices = @transform_1, window_bounds = array<i64: 8, 128>}, {pipeline_mode = #tpu.pipeline_mode<synchronous>, transform_indices = @transform_2, window_bounds = array<i64: 784, 256>}, {pipeline_mode = #tpu.pipeline_mode<synchronous>, transform_indices = @transform_3, window_bounds = array<i64: 1, 256>}, {pipeline_mode = #tpu.pipeline_mode<synchronous>, transform_indices = @transform_4, window_bounds = array<i64: 256, 64>}, {pipeline_mode = #tpu.pipeline_mode<synchronous>, transform_indices = @transform_5, window_bounds = array<i64: 1, 64>}, {pipeline_mode = #tpu.pipeline_mode<synchronous>, transform_indices = @transform_6, window_bounds = array<i64: 64, 128>}, {pipeline_mode = #tpu.pipeline_mode<synchronous>, transform_indices = @transform_7, window_bounds = array<i64: 1, 128>}, {pipeline_mode = #tpu.pipeline_mode<synchronous>, transform_indices = @transform_8, window_bounds = array<i64: 128, 64>}, {pipeline_mode = #tpu.pipeline_mode<synchronous>, transform_indices = @transform_9, window_bounds = array<i64: 1, 64>}, {pipeline_mode = #tpu.pipeline_mode<synchronous>, transform_indices = @transform_10, window_bounds = array<i64: 64, 256>}, {pipeline_mode = #tpu.pipeline_mode<synchronous>, transform_indices = @transform_11, window_bounds = array<i64: 1, 256>}, {pipeline_mode = #tpu.pipeline_mode<synchronous>, transform_indices = @transform_12, window_bounds = array<i64: 256, 784>}, {pipeline_mode = #tpu.pipeline_mode<synchronous>, transform_indices = @transform_13, window_bounds = array<i64: 1, 784>}, {transform_indices = @transform_14, window_bounds = array<i64: 8, 128>}, {transform_indices = @transform_15, window_bounds = array<i64: 8, 784>}]} {
    %c0 = arith.constant 0 : index
    %c0_0 = arith.constant 0 : index
    %0 = vector.load %arg1[%c0, %c0_0] : memref<8x784xf32, #tpu.memory_space<vmem>>, vector<8x784xf32>
    %1 = arith.truncf %0 : vector<8x784xf32> to vector<8x784xbf16>
    %c0_1 = arith.constant 0 : index
    %c0_2 = arith.constant 0 : index
    %2 = vector.load %arg3[%c0_1, %c0_2] : memref<784x256xbf16, #tpu.memory_space<vmem>>, vector<784x256xbf16>
    %cst = arith.constant dense<0.000000e+00> : vector<8x256xf32>
    %3 = tpu.matmul %1, %2, %cst {dimension_numbers = #tpu.dot_dimension_numbers<[1], [0], [0], [1], [0, 0, 1, 1], [], []>} : vector<8x784xbf16>, vector<784x256xbf16>, vector<8x256xf32> -> vector<8x256xf32>
    %c0_3 = arith.constant 0 : index
    %c0_4 = arith.constant 0 : index
    %4 = vector.load %arg4[%c0_3, %c0_4] : memref<1x256xf32, #tpu.memory_space<vmem>>, vector<1x256xf32>
    %5 = vector.broadcast %4 : vector<1x256xf32> to vector<8x256xf32>
    %6 = arith.addf %3, %5 : vector<8x256xf32>
    %cst_5 = arith.constant 0.000000e+00 : f32
    %7 = vector.broadcast %cst_5 : f32 to vector<8x256xf32>
    %8 = arith.maximumf %6, %7 : vector<8x256xf32>
    %9 = arith.truncf %8 : vector<8x256xf32> to vector<8x256xbf16>
    %c0_6 = arith.constant 0 : index
    %c0_7 = arith.constant 0 : index
    %10 = vector.load %arg5[%c0_6, %c0_7] : memref<256x64xbf16, #tpu.memory_space<vmem>>, vector<256x64xbf16>
    %cst_8 = arith.constant dense<0.000000e+00> : vector<8x64xf32>
    %11 = tpu.matmul %9, %10, %cst_8 {dimension_numbers = #tpu.dot_dimension_numbers<[1], [0], [0], [1], [0, 0, 1, 1], [], []>} : vector<8x256xbf16>, vector<256x64xbf16>, vector<8x64xf32> -> vector<8x64xf32>
    %c0_9 = arith.constant 0 : index
    %c0_10 = arith.constant 0 : index
    %12 = vector.load %arg6[%c0_9, %c0_10] : memref<1x64xf32, #tpu.memory_space<vmem>>, vector<1x64xf32>
    %13 = vector.broadcast %12 : vector<1x64xf32> to vector<8x64xf32>
    %14 = arith.addf %11, %13 : vector<8x64xf32>
    %cst_11 = arith.constant 0.000000e+00 : f32
    %15 = vector.broadcast %cst_11 : f32 to vector<8x64xf32>
    %16 = arith.maximumf %14, %15 : vector<8x64xf32>
    %17 = arith.truncf %16 : vector<8x64xf32> to vector<8x64xbf16>
    %c0_12 = arith.constant 0 : index
    %c0_13 = arith.constant 0 : index
    %18 = vector.load %arg7[%c0_12, %c0_13] : memref<64x128xbf16, #tpu.memory_space<vmem>>, vector<64x128xbf16>
    %cst_14 = arith.constant dense<0.000000e+00> : vector<8x128xf32>
    %19 = tpu.matmul %17, %18, %cst_14 {dimension_numbers = #tpu.dot_dimension_numbers<[1], [0], [0], [1], [0, 0, 1, 1], [], []>} : vector<8x64xbf16>, vector<64x128xbf16>, vector<8x128xf32> -> vector<8x128xf32>
    %c0_15 = arith.constant 0 : index
    %c0_16 = arith.constant 0 : index
    %20 = vector.load %arg8[%c0_15, %c0_16] : memref<1x128xf32, #tpu.memory_space<vmem>>, vector<1x128xf32>
    %21 = vector.broadcast %20 : vector<1x128xf32> to vector<8x128xf32>
    %22 = arith.addf %19, %21 : vector<8x128xf32>
    %cst_17 = arith.constant 0.000000e+00 : f32
    %23 = vector.broadcast %cst_17 : f32 to vector<8x128xf32>
    %24 = arith.maximumf %22, %23 : vector<8x128xf32>
    %c0_18 = arith.constant 0 : index
    %c0_19 = arith.constant 0 : index
    %25 = vector.load %arg2[%c0_18, %c0_19] : memref<8x128xf32, #tpu.memory_space<vmem>>, vector<8x128xf32>
    %26 = arith.mulf %24, %25 : vector<8x128xf32>
    %c0_20 = arith.constant 0 : index
    %c0_21 = arith.constant 0 : index
    %27 = vector.load %arg15[%c0_20, %c0_21] : memref<8x128xf32, #tpu.memory_space<vmem>>, vector<8x128xf32>
    tpu.vector_store %arg15[%c0_20, %c0_21], %26 {strides = array<i32>} : memref<8x128xf32, #tpu.memory_space<vmem>>, vector<8x128xf32>,
    %28 = arith.truncf %26 : vector<8x128xf32> to vector<8x128xbf16>
    %c0_22 = arith.constant 0 : index
    %c0_23 = arith.constant 0 : index
    %29 = vector.load %arg9[%c0_22, %c0_23] : memref<128x64xbf16, #tpu.memory_space<vmem>>, vector<128x64xbf16>
    %cst_24 = arith.constant dense<0.000000e+00> : vector<8x64xf32>
    %30 = tpu.matmul %28, %29, %cst_24 {dimension_numbers = #tpu.dot_dimension_numbers<[1], [0], [0], [1], [0, 0, 1, 1], [], []>} : vector<8x128xbf16>, vector<128x64xbf16>, vector<8x64xf32> -> vector<8x64xf32>
    %c0_25 = arith.constant 0 : index
    %c0_26 = arith.constant 0 : index
    %31 = vector.load %arg10[%c0_25, %c0_26] : memref<1x64xf32, #tpu.memory_space<vmem>>, vector<1x64xf32>
    %32 = vector.broadcast %31 : vector<1x64xf32> to vector<8x64xf32>
    %33 = arith.addf %30, %32 : vector<8x64xf32>
    %cst_27 = arith.constant 0.000000e+00 : f32
    %34 = vector.broadcast %cst_27 : f32 to vector<8x64xf32>
    %35 = arith.maximumf %33, %34 : vector<8x64xf32>
    %36 = arith.truncf %35 : vector<8x64xf32> to vector<8x64xbf16>
    %c0_28 = arith.constant 0 : index
    %c0_29 = arith.constant 0 : index
    %37 = vector.load %arg11[%c0_28, %c0_29] : memref<64x256xbf16, #tpu.memory_space<vmem>>, vector<64x256xbf16>
    %cst_30 = arith.constant dense<0.000000e+00> : vector<8x256xf32>
    %38 = tpu.matmul %36, %37, %cst_30 {dimension_numbers = #tpu.dot_dimension_numbers<[1], [0], [0], [1], [0, 0, 1, 1], [], []>} : vector<8x64xbf16>, vector<64x256xbf16>, vector<8x256xf32> -> vector<8x256xf32>
    %c0_31 = arith.constant 0 : index
    %c0_32 = arith.constant 0 : index
    %39 = vector.load %arg12[%c0_31, %c0_32] : memref<1x256xf32, #tpu.memory_space<vmem>>, vector<1x256xf32>
    %40 = vector.broadcast %39 : vector<1x256xf32> to vector<8x256xf32>
    %41 = arith.addf %38, %40 : vector<8x256xf32>
    %cst_33 = arith.constant 0.000000e+00 : f32
    %42 = vector.broadcast %cst_33 : f32 to vector<8x256xf32>
    %43 = arith.maximumf %41, %42 : vector<8x256xf32>
    %44 = arith.truncf %43 : vector<8x256xf32> to vector<8x256xbf16>
    %c0_34 = arith.constant 0 : index
    %c0_35 = arith.constant 0 : index
    %45 = vector.load %arg13[%c0_34, %c0_35] : memref<256x784xbf16, #tpu.memory_space<vmem>>, vector<256x784xbf16>
    %cst_36 = arith.constant dense<0.000000e+00> : vector<8x784xf32>
    %46 = tpu.matmul %44, %45, %cst_36 {dimension_numbers = #tpu.dot_dimension_numbers<[1], [0], [0], [1], [0, 0, 1, 1], [], []>} : vector<8x256xbf16>, vector<256x784xbf16>, vector<8x784xf32> -> vector<8x784xf32>
    %c0_37 = arith.constant 0 : index
    %c0_38 = arith.constant 0 : index
    %47 = vector.load %arg14[%c0_37, %c0_38] : memref<1x784xf32, #tpu.memory_space<vmem>>, vector<1x784xf32>
    %48 = vector.broadcast %47 : vector<1x784xf32> to vector<8x784xf32>
    %49 = arith.addf %46, %48 : vector<8x784xf32>
    %cst_39 = arith.constant 0.000000e+00 : f32
    %50 = vector.broadcast %cst_39 : f32 to vector<8x784xf32>
    %51 = arith.maximumf %49, %50 : vector<8x784xf32>
    %c0_40 = arith.constant 0 : index
    %c0_41 = arith.constant 0 : index
    %52 = vector.load %arg16[%c0_40, %c0_41] : memref<8x784xf32, #tpu.memory_space<vmem>>, vector<8x784xf32>
    tpu.vector_store %arg16[%c0_40, %c0_41], %51 {strides = array<i32>} : memref<8x784xf32, #tpu.memory_space<vmem>>, vector<8x784xf32>,
    return
  }
  func.func @transform_0(%arg0: i32) -> (i32, i32) {
    %c0_i32 = arith.constant 0 : i32
    %c0_i32_0 = arith.constant 0 : i32
    return %arg0, %c0_i32 : i32, i32
  }
  func.func @transform_1(%arg0: i32) -> (i32, i32) {
    %c0_i32 = arith.constant 0 : i32
    %c0_i32_0 = arith.constant 0 : i32
    return %arg0, %c0_i32 : i32, i32
  }
  func.func @transform_2(%arg0: i32) -> (i32, i32) {
    %c0_i32 = arith.constant 0 : i32
    %c0_i32_0 = arith.constant 0 : i32
    %c0_i32_1 = arith.constant 0 : i32
    return %c0_i32, %c0_i32_0 : i32, i32
  }
  func.func @transform_3(%arg0: i32) -> (i32, i32) {
    %c0_i32 = arith.constant 0 : i32
    %c0_i32_0 = arith.constant 0 : i32
    %c0_i32_1 = arith.constant 0 : i32
    return %c0_i32, %c0_i32_0 : i32, i32
  }
  func.func @transform_4(%arg0: i32) -> (i32, i32) {
    %c0_i32 = arith.constant 0 : i32
    %c0_i32_0 = arith.constant 0 : i32
    %c0_i32_1 = arith.constant 0 : i32
    return %c0_i32, %c0_i32_0 : i32, i32
  }
  func.func @transform_5(%arg0: i32) -> (i32, i32) {
    %c0_i32 = arith.constant 0 : i32
    %c0_i32_0 = arith.constant 0 : i32
    %c0_i32_1 = arith.constant 0 : i32
    return %c0_i32, %c0_i32_0 : i32, i32
  }
  func.func @transform_6(%arg0: i32) -> (i32, i32) {
    %c0_i32 = arith.constant 0 : i32
    %c0_i32_0 = arith.constant 0 : i32
    %c0_i32_1 = arith.constant 0 : i32
    return %c0_i32, %c0_i32_0 : i32, i32
  }
  func.func @transform_7(%arg0: i32) -> (i32, i32) {
    %c0_i32 = arith.constant 0 : i32
    %c0_i32_0 = arith.constant 0 : i32
    %c0_i32_1 = arith.constant 0 : i32
    return %c0_i32, %c0_i32_0 : i32, i32
  }
  func.func @transform_8(%arg0: i32) -> (i32, i32) {
    %c0_i32 = arith.constant 0 : i32
    %c0_i32_0 = arith.constant 0 : i32
    %c0_i32_1 = arith.constant 0 : i32
    return %c0_i32, %c0_i32_0 : i32, i32
  }
  func.func @transform_9(%arg0: i32) -> (i32, i32) {
    %c0_i32 = arith.constant 0 : i32
    %c0_i32_0 = arith.constant 0 : i32
    %c0_i32_1 = arith.constant 0 : i32
    return %c0_i32, %c0_i32_0 : i32, i32
  }
  func.func @transform_10(%arg0: i32) -> (i32, i32) {
    %c0_i32 = arith.constant 0 : i32
    %c0_i32_0 = arith.constant 0 : i32
    %c0_i32_1 = arith.constant 0 : i32
    return %c0_i32, %c0_i32_0 : i32, i32
  }
  func.func @transform_11(%arg0: i32) -> (i32, i32) {
    %c0_i32 = arith.constant 0 : i32
    %c0_i32_0 = arith.constant 0 : i32
    %c0_i32_1 = arith.constant 0 : i32
    return %c0_i32, %c0_i32_0 : i32, i32
  }
  func.func @transform_12(%arg0: i32) -> (i32, i32) {
    %c0_i32 = arith.constant 0 : i32
    %c0_i32_0 = arith.constant 0 : i32
    %c0_i32_1 = arith.constant 0 : i32
    return %c0_i32, %c0_i32_0 : i32, i32
  }
  func.func @transform_13(%arg0: i32) -> (i32, i32) {
    %c0_i32 = arith.constant 0 : i32
    %c0_i32_0 = arith.constant 0 : i32
    %c0_i32_1 = arith.constant 0 : i32
    return %c0_i32, %c0_i32_0 : i32, i32
  }
  func.func @transform_14(%arg0: i32) -> (i32, i32) {
    %c0_i32 = arith.constant 0 : i32
    %c0_i32_0 = arith.constant 0 : i32
    return %arg0, %c0_i32 : i32, i32
  }
  func.func @transform_15(%arg0: i32) -> (i32, i32) {
    %c0_i32 = arith.constant 0 : i32
    %c0_i32_0 = arith.constant 0 : i32
    return %arg0, %c0_i32 : i32, i32
  }
}

</mosaic_0001>

<bundles_post_ra>
// kernel: tpu_custom_call.1
= control target key start
LH: loop header
LB: loop body
LE: loop exit
PB: predicated region body
PF: predicated region fallthrough
CT: control target
= control target key end

     0   :  { %21 = vsyncpa [#allocation3], 0  ;;  %vm666_vm0 = vcmask 130048   ;;  %s3926_s0 = inlined_call_operand.vmem [shape: f32[8,784], index: 0, kind: input, shape index: {}]   ;;  %s3927_s1 = inlined_call_operand.vmem [shape: f32[8,128], index: 1, kind: input, shape index: {}]   ;;  %s3928_s2 = inlined_call_operand.vmem [shape: bf16[784,256], index: 2, kind: input, shape index: {}]   ;;  %s3929_s3 = inlined_call_operand.vmem [shape: f32[1,256], index: 3, kind: input, shape index: {}]   ;;  %s3930_s4 = inlined_call_operand.vmem [shape: bf16[256,64], index: 4, kind: input, shape index: {}]   ;;  %s3931_s5 = inlined_call_operand.vmem [shape: f32[1,64], index: 5, kind: input, shape index: {}]   ;;  %s3932_s6 = inlined_call_operand.vmem [shape: bf16[64,128], index: 6, kind: input, shape index: {}]   ;;  %s3933_s7 = inlined_call_operand.vmem [shape: f32[1,128], index: 7, kind: input, shape index: {}]   ;;  %s3934_s8 = inlined_call_operand.vmem [shape: bf16[128,64], index: 8, kind: input, shape index: {}]   ;;  %s3935_s9 = inlined_call_operand.vmem [shape: f32[1,64], index: 9, kind: input, shape index: {}]   ;;  %s3936_s10 = inlined_call_operand.vmem [shape: bf16[64,256], index: 10, kind: input, shape index: {}]   ;;  %s3937_s11 = inlined_call_operand.vmem [shape: f32[1,256], index: 11, kind: input, shape index: {}]   ;;  %s3938_s12 = inlined_call_operand.vmem [shape: bf16[256,784], index: 12, kind: input, shape index: {}]   ;;  %s3939_s13 = inlined_call_operand.vmem [shape: f32[1,784], index: 13, kind: input, shape index: {}]   ;;  %s3940_s14 = inlined_call_operand.hbm [shape: f32[8,128], index: 14, kind: output, shape index: {0}]   ;;  %s3941_s15 = inlined_call_operand.hbm [shape: f32[8,784], index: 15, kind: output, shape index: {1}]  }
   0x1   :  { %v2617_v0 = vld [vmem:[%s3928_s2 + $0x74] ss:$8 sps:$4 sm:$0xff]   ;;  %v2619_v1 = vld [vmem:[%s3928_s2 + $0x70] ss:$8 sps:$4 sm:$0xff]   ;;  %v2623_v4 = vld [vmem:[%s3928_s2 + $0x64] ss:$8 sps:$4 sm:$0xff]  }
   0x2   :  { %670 = vmatprep.subr.bf16.mxu0 %v2617_v0  ;;  %v2620_v2 = vld [vmem:[%s3928_s2 + $0x174] ss:$8 sps:$4 sm:$0xff]   ;;  %v2622_v3 = vld [vmem:[%s3928_s2 + $0x170] ss:$8 sps:$4 sm:$0xff]   ;;  %v2625_v5 = vld [vmem:[%s3928_s2 + $0x60] ss:$8 sps:$4 sm:$0xff]  }
   0x3   :  { %671 = vmatpush1.bf16.msra.mxu0 %v2619_v1  ;;  %711 = vmatprep.subr.bf16.mxu1 %v2620_v2  ;;  %v2626_v6 = vld [vmem:[%s3928_s2 + $0x164] ss:$8 sps:$4 sm:$0xff]   ;;  %v2628_v7 = vld [vmem:[%s3928_s2 + $0x160] ss:$8 sps:$4 sm:$0xff]   ;;  %v2629_v8 = vld [vmem:[%s3928_s2 + $0x54] ss:$8 sps:$4 sm:$0xff]  }
   0x4   :  { %712 = vmatpush1.bf16.msra.mxu1 %v2622_v3  ;;  %672 = vmatprep.subr.bf16.mxu0 %v2623_v4  ;;  %v2631_v9 = vld [vmem:[%s3928_s2 + $0x50] ss:$8 sps:$4 sm:$0xff]   ;;  %v2632_v10 = vld [vmem:[%s3928_s2 + $0x154] ss:$8 sps:$4 sm:$0xff]   ;;  %v2635_v11 = vld [vmem:[%s3928_s2 + $0x44] ss:$8 sps:$4 sm:$0xff]  }
   0x5   :  { %713 = vmatprep.subr.bf16.mxu1 %v2626_v6  ;;  %v2634_v12 = vld [vmem:[%s3928_s2 + $0x150] ss:$8 sps:$4 sm:$0xff]   ;;  %v2638_v13 = vld [vmem:[%s3928_s2 + $0x144] ss:$8 sps:$4 sm:$0xff]   ;;  %v2637_v14 = vld [vmem:[%s3928_s2 + $0x40] ss:$8 sps:$4 sm:$0xff]  }
   0x6   :  { %v2641_v15 = vld [vmem:[%s3928_s2 + $0x34] ss:$8 sps:$4 sm:$0xff]   ;;  %v2640_v16 = vld [vmem:[%s3928_s2 + $0x140] ss:$8 sps:$4 sm:$0xff]   ;;  %v2643_v18 = vld [vmem:[%s3928_s2 + $0x30] ss:$8 sps:$4 sm:$0xff]  }
   0x7   :  { %673 = vmatpush1.bf16.msra.mxu0 %v2625_v5  ;;  %v2644_v17 = vld [vmem:[%s3928_s2 + $0x134] ss:$8 sps:$4 sm:$0xff]   ;;  %v2647_v19 = vld [vmem:[%s3928_s2 + $0x24] ss:$8 sps:$4 sm:$0xff]   ;;  %v2646_v20 = vld [vmem:[%s3928_s2 + $0x130] ss:$8 sps:$4 sm:$0xff]  }
   0x8   :  { %674 = vmatprep.subr.bf16.mxu0 %v2629_v8  ;;  %714 = vmatpush1.bf16.msra.mxu1 %v2628_v7  ;;  %v2650_v21 = vld [vmem:[%s3928_s2 + $0x124] ss:$8 sps:$4 sm:$0xff]   ;;  %v2649_v22 = vld [vmem:[%s3928_s2 + $0x20] ss:$8 sps:$4 sm:$0xff]   ;;  %v2653_v23 = vld [vmem:[%s3928_s2 + $0x14] ss:$8 sps:$4 sm:$0xff]  }
   0x9   :  { %715 = vmatprep.subr.bf16.mxu1 %v2632_v10  ;;  %v2652_v24 = vld [vmem:[%s3928_s2 + $0x120] ss:$8 sps:$4 sm:$0xff]   ;;  %v2656_v25 = vld [vmem:[%s3928_s2 + $0x114] ss:$8 sps:$4 sm:$0xff]   ;;  %v2655_v26 = vld [vmem:[%s3928_s2 + $0x10] ss:$8 sps:$4 sm:$0xff]  }
   0xa   :  { %v2659_v27 = vld [vmem:[%s3928_s2 + $0x4] ss:$8 sps:$4 sm:$0xff]   ;;  %v2658_v28 = vld [vmem:[%s3928_s2 + $0x110] ss:$8 sps:$4 sm:$0xff]   ;;  %v2661_v30 = vld [vmem:[%s3928_s2] ss:$8 sps:$4 sm:$0xff]  }
   0xb   :  { %675 = vmatpush1.bf16.msra.mxu0 %v2631_v9  ;;  %v2662_v29 = vld [vmem:[%s3928_s2 + $0x104] ss:$8 sps:$4 sm:$0xff]   ;;  %v2665_v31 = vld [vmem:[%s3928_s2 + $0xf4] ss:$8 sps:$4 sm:$0xff]   ;;  %v2664_v32 = vld [vmem:[%s3928_s2 + $0x100] ss:$8 sps:$4 sm:$0xff]  }
   0xc   :  { %676 = vmatprep.subr.bf16.mxu0 %v2635_v11  ;;  %716 = vmatpush1.bf16.msra.mxu1 %v2634_v12  ;;  %v2668_v33 = vld [vmem:[%s3928_s2 + $0x1f4] ss:$8 sps:$4 sm:$0xff]   ;;  %v2667_v34 = vld [vmem:[%s3928_s2 + $0xf0] ss:$8 sps:$4 sm:$0xff]   ;;  %v2671_v35 = vld [vmem:[%s3928_s2 + $0xe4] ss:$8 sps:$4 sm:$0xff]  }
   0xd   :  { %717 = vmatprep.subr.bf16.mxu1 %v2638_v13  ;;  %v2670_v36 = vld [vmem:[%s3928_s2 + $0x1f0] ss:$8 sps:$4 sm:$0xff]   ;;  %v2674_v37 = vld [vmem:[%s3928_s2 + $0x1e4] ss:$8 sps:$4 sm:$0xff]   ;;  %v2673_v38 = vld [vmem:[%s3928_s2 + $0xe0] ss:$8 sps:$4 sm:$0xff]  }
   0xe   :  { %v2677_v39 = vld [vmem:[%s3928_s2 + $0xd4] ss:$8 sps:$4 sm:$0xff]   ;;  %v2676_v40 = vld [vmem:[%s3928_s2 + $0x1e0] ss:$8 sps:$4 sm:$0xff]   ;;  %v2679_v42 = vld [vmem:[%s3928_s2 + $0xd0] ss:$8 sps:$4 sm:$0xff]  }
   0xf   :  { %677 = vmatpush1.bf16.msra.mxu0 %v2637_v14  ;;  %v2680_v41 = vld [vmem:[%s3928_s2 + $0x1d4] ss:$8 sps:$4 sm:$0xff]   ;;  %v2683_v43 = vld [vmem:[%s3928_s2 + $0xc4] ss:$8 sps:$4 sm:$0xff]   ;;  %v2682_v44 = vld [vmem:[%s3928_s2 + $0x1d0] ss:$8 sps:$4 sm:$0xff]  }
  0x10   :  { %678 = vmatprep.subr.bf16.mxu0 %v2641_v15  ;;  %718 = vmatpush1.bf16.msra.mxu1 %v2640_v16  ;;  %v2686_v45 = vld [vmem:[%s3928_s2 + $0x1c4] ss:$8 sps:$4 sm:$0xff]   ;;  %v2685_v47 = vld [vmem:[%s3928_s2 + $0xc0] ss:$8 sps:$4 sm:$0xff]   ;;  %v2689_v49 = vld [vmem:[%s3928_s2 + $0xb4] ss:$8 sps:$4 sm:$0xff]  }
  0x11   :  { %719 = vmatprep.subr.bf16.mxu1 %v2644_v17  ;;  %v53_v46 = vld [vmem:[%s3926_s0 + $0x8] sm:$0xff]  ;;  %v55_v50 = vld [vmem:[%s3926_s0 + $0x18] sm:$0xff]  ;;  %v52_v4 = vld [vmem:[%s3926_s0] sm:$0xff] }
  0x12   :  { %v60_v48 = vpack.c.bf16 %v53_v46, %v53_v46  ;;  %v2688_v51 = vld [vmem:[%s3928_s2 + $0x1c0] ss:$8 sps:$4 sm:$0xff]   ;;  %v62_v52 = vpack.c.bf16 %v55_v50, %v55_v50  ;;  %v2692_v53 = vld [vmem:[%s3928_s2 + $0x1b4] ss:$8 sps:$4 sm:$0xff]   ;;  %v2691_v54 = vld [vmem:[%s3928_s2 + $0xb0] ss:$8 sps:$4 sm:$0xff]   ;;  %v59_v7 = vpack.c.bf16 %v52_v4, %v52_v4 }
  0x13   :  { %679 = vmatpush1.bf16.msra.mxu0 %v2643_v18  ;;  %v2695_v55 = vld [vmem:[%s3928_s2 + $0xa4] ss:$8 sps:$4 sm:$0xff]   ;;  %v2694_v56 = vld [vmem:[%s3928_s2 + $0x1b0] ss:$8 sps:$4 sm:$0xff]   ;;  %v2697_v58 = vld [vmem:[%s3928_s2 + $0xa0] ss:$8 sps:$4 sm:$0xff]  }
  0x14   :  { %680 = vmatprep.subr.bf16.mxu0 %v2647_v19  ;;  %720 = vmatpush1.bf16.msra.mxu1 %v2646_v20  ;;  %v2698_v57 = vld [vmem:[%s3928_s2 + $0x1a4] ss:$8 sps:$4 sm:$0xff]   ;;  %v2701_v59 = vld [vmem:[%s3928_s2 + $0x94] ss:$8 sps:$4 sm:$0xff]   ;;  %v2700_v60 = vld [vmem:[%s3928_s2 + $0x1a0] ss:$8 sps:$4 sm:$0xff]  }
  0x15   :  { %721 = vmatprep.subr.bf16.mxu1 %v2650_v21  ;;  %702 = vmatprep.mubr.bf16.mxu0 %v60_v48  ;;  %v2704_v61 = vld [vmem:[%s3928_s2 + $0x194] ss:$8 sps:$4 sm:$0xff]   ;;  %v2703_v62 = vld [vmem:[%s3928_s2 + $0x90] ss:$8 sps:$4 sm:$0xff]   ;;  %v2707_v63 = vld [vmem:[%s3928_s2 + $0x84] ss:$8 sps:$4 sm:$0xff]  }
  0x16   :  { %743 = vmatprep.mubr.bf16.mxu1 %v62_v52  ;;  %v2706_v0 = vld [vmem:[%s3928_s2 + $0x190] ss:$8 sps:$4 sm:$0xff]   ;;  %v2709_v1 = vld [vmem:[%s3928_s2 + $0x80] ss:$8 sps:$4 sm:$0xff]   ;;  %v2710_v2 = vld [vmem:[%s3928_s2 + $0x184] ss:$8 sps:$4 sm:$0xff]  }
  0x17   :  { %681 = vmatpush1.bf16.msra.mxu0 %v2649_v22  ;;  %v2712_v3 = vld [vmem:[%s3928_s2 + $0x180] ss:$8 sps:$4 sm:$0xff]   ;;  %v2715_v5 = vld [vmem:[%s3928_s2 + $0x274] ss:$8 sps:$4 sm:$0xff]   ;;  %v2713_v8 = vld [vmem:[%s3928_s2 + $0x270] ss:$8 sps:$4 sm:$0xff]  }
  0x18   :  { %682 = vmatprep.subr.bf16.mxu0 %v2653_v23  ;;  %722 = vmatpush1.bf16.msra.mxu1 %v2652_v24  ;;  %v54_v6 = vld [vmem:[%s3926_s0 + $0x10] sm:$0xff]  ;;  %v2718_v9 = vld [vmem:[%s3928_s2 + $0x264] ss:$8 sps:$4 sm:$0xff]   ;;  %v2758_v11 = vld [vmem:[%s3928_s2 + $0x300] ss:$8 sps:$4 sm:$0xff]   ;;  %v3008_v19 = vmov 0  }
  0x19   :  { %723 = vmatprep.subr.bf16.mxu1 %v2656_v25  ;;  %v61_v10 = vpack.c.bf16 %v54_v6, %v54_v6  ;;  %v2760_v12 = vld [vmem:[%s3928_s2 + $0x304] ss:$8 sps:$4 sm:$0xff]   ;;  %v2716_v13 = vld [vmem:[%s3928_s2 + $0x260] ss:$8 sps:$4 sm:$0xff]   ;;  %v2721_v14 = vld [vmem:[%s3928_s2 + $0x254] ss:$8 sps:$4 sm:$0xff]  }
  0x1a   :  { %v58_v15 = vld [vmem:[%s3926_s0 + $0x30] sm:$0xff]  ;;  %v57_v16 = vld [vmem:[%s3926_s0 + $0x28] sm:$0xff] }
  0x1b   :  { %683 = vmatpush1.bf16.msra.mxu0 %v2655_v26  ;;  %v64_v17 = vpack.c.bf16 %v57_v16, %v57_v16  ;;  %v2719_v18 = vld [vmem:[%s3928_s2 + $0x250] ss:$8 sps:$4 sm:$0xff]   ;;  %v2724_v20 = vld [vmem:[%s3928_s2 + $0x244] ss:$8 sps:$4 sm:$0xff]   ;;  %v65_v21 = vpack.c.bf16 %v58_v15, %v58_v15  ;;  %v2722_v22 = vld [vmem:[%s3928_s2 + $0x240] ss:$8 sps:$4 sm:$0xff]  }
  0x1c   :  { %684 = vmatprep.subr.bf16.mxu0 %v2659_v27  ;;  %724 = vmatpush1.bf16.msra.mxu1 %v2658_v28  ;;  %v2727_v23 = vld [vmem:[%s3928_s2 + $0x234] ss:$8 sps:$4 sm:$0xff]   ;;  %v2725_v24 = vld [vmem:[%s3928_s2 + $0x230] ss:$8 sps:$4 sm:$0xff]   ;;  %v2730_v25 = vld [vmem:[%s3928_s2 + $0x224] ss:$8 sps:$4 sm:$0xff]  }
  0x1d   :  { %725 = vmatprep.subr.bf16.mxu1 %v2662_v29  ;;  %v2728_v26 = vld [vmem:[%s3928_s2 + $0x220] ss:$8 sps:$4 sm:$0xff]   ;;  %v2733_v27 = vld [vmem:[%s3928_s2 + $0x214] ss:$8 sps:$4 sm:$0xff]   ;;  %v2731_v28 = vld [vmem:[%s3928_s2 + $0x210] ss:$8 sps:$4 sm:$0xff]  }
  0x1e   :  { %v2736_v29 = vld [vmem:[%s3928_s2 + $0x204] ss:$8 sps:$4 sm:$0xff]   ;;  %v2761_v46 = vld [vmem:[%s3928_s2 + $0x280] ss:$8 sps:$4 sm:$0xff]  }
  0x1f   :  { %685 = vmatpush1.bf16.msra.mxu0 %v2661_v30  ;;  %v2734_v30 = vld [vmem:[%s3928_s2 + $0x200] ss:$8 sps:$4 sm:$0xff]  }
  0x20   :  { %686 = vmatprep.subr.bf16.mxu0 %v2665_v31  ;;  %726 = vmatpush1.bf16.msra.mxu1 %v2664_v32  ;;  %v2739_v31 = vld [vmem:[%s3928_s2 + $0x2f4] ss:$8 sps:$4 sm:$0xff]   ;;  %v2737_v32 = vld [vmem:[%s3928_s2 + $0x2f0] ss:$8 sps:$4 sm:$0xff]  }
  0x21   :  { %727 = vmatprep.subr.bf16.mxu1 %v2668_v33  ;;  %v2742_v33 = vld [vmem:[%s3928_s2 + $0x2e4] ss:$8 sps:$4 sm:$0xff]  }
  0x23   :  { %687 = vmatpush2.bf16.msra.mxu0 %v2667_v34  ;;  %v2740_v34 = vld [vmem:[%s3928_s2 + $0x2e0] ss:$8 sps:$4 sm:$0xff]  }
  0x24   :  { %688 = vmatprep.subr.bf16.mxu0 %v2671_v35  ;;  %728 = vmatpush2.bf16.msra.mxu1 %v2670_v36  ;;  %v2745_v35 = vld [vmem:[%s3928_s2 + $0x2d4] ss:$8 sps:$4 sm:$0xff]   ;;  %v2743_v36 = vld [vmem:[%s3928_s2 + $0x2d0] ss:$8 sps:$4 sm:$0xff]  }
  0x25   :  { %729 = vmatprep.subr.bf16.mxu1 %v2674_v37  ;;  %v2748_v37 = vld [vmem:[%s3928_s2 + $0x2c4] ss:$8 sps:$4 sm:$0xff]  }
  0x27   :  { %689 = vmatpush2.bf16.msra.mxu0 %v2673_v38  ;;  %v2746_v38 = vld [vmem:[%s3928_s2 + $0x2c0] ss:$8 sps:$4 sm:$0xff]  }
  0x28   :  { %690 = vmatprep.subr.bf16.mxu0 %v2677_v39  ;;  %730 = vmatpush2.bf16.msra.mxu1 %v2676_v40  ;;  %v2751_v39 = vld [vmem:[%s3928_s2 + $0x2b4] ss:$8 sps:$4 sm:$0xff]   ;;  %v2749_v40 = vld [vmem:[%s3928_s2 + $0x2b0] ss:$8 sps:$4 sm:$0xff]  }
  0x29   :  { %731 = vmatprep.subr.bf16.mxu1 %v2680_v41  ;;  %v2754_v41 = vld [vmem:[%s3928_s2 + $0x2a4] ss:$8 sps:$4 sm:$0xff]  }
  0x2b   :  { %691 = vmatpush2.bf16.msra.mxu0 %v2679_v42  ;;  %v2752_v42 = vld [vmem:[%s3928_s2 + $0x2a0] ss:$8 sps:$4 sm:$0xff]  }
  0x2c   :  { %692 = vmatprep.subr.bf16.mxu0 %v2683_v43  ;;  %732 = vmatpush2.bf16.msra.mxu1 %v2682_v44  ;;  %v2757_v43 = vld [vmem:[%s3928_s2 + $0x294] ss:$8 sps:$4 sm:$0xff]   ;;  %v2755_v44 = vld [vmem:[%s3928_s2 + $0x290] ss:$8 sps:$4 sm:$0xff]  }
  0x2d   :  { %733 = vmatprep.subr.bf16.mxu1 %v2686_v45  ;;  %v2763_v45 = vld [vmem:[%s3928_s2 + $0x284] ss:$8 sps:$4 sm:$0xff]  }
  0x2f   :  { %693 = vmatpush2.bf16.msra.mxu0 %v2685_v47  ;;  %v56_v47 = vld [vmem:[%s3926_s0 + $0x20] sm:$0xff] }
  0x30   :  { %694 = vmatprep.subr.bf16.mxu0 %v2689_v49  ;;  %734 = vmatpush2.bf16.msra.mxu1 %v2688_v51  ;;  %v63_v48 = vpack.c.bf16 %v56_v47, %v56_v47 }
  0x31   :  { %735 = vmatprep.subr.bf16.mxu1 %v2692_v53 }
  0x33   :  { %695 = vmatpush2.bf16.msra.mxu0 %v2691_v54 }
  0x34   :  { %696 = vmatprep.subr.bf16.mxu0 %v2695_v55  ;;  %736 = vmatpush2.bf16.msra.mxu1 %v2694_v56 }
  0x35   :  { %737 = vmatprep.subr.bf16.mxu1 %v2698_v57 }
  0x37   :  { %697 = vmatpush2.bf16.msra.mxu0 %v2697_v58 }
  0x38   :  { %698 = vmatprep.subr.bf16.mxu0 %v2701_v59  ;;  %738 = vmatpush2.bf16.msra.mxu1 %v2700_v60 }
  0x39   :  { %739 = vmatprep.subr.bf16.mxu1 %v2704_v61 }
  0x3b   :  { %699 = vmatpush2.bf16.msra.mxu0 %v2703_v62 }
  0x3c   :  { %700 = vmatprep.subr.bf16.mxu0 %v2707_v63  ;;  %740 = vmatpush2.bf16.msra.mxu1 %v2706_v0 }
  0x3d   :  { %741 = vmatprep.subr.bf16.mxu1 %v2710_v2 }
  0x3f   :  { %701 = vmatpush2.bf16.msra.mxu0 %v2709_v1 }
  0x40   :  { %752 = vmatprep.subr.bf16.mxu0 %v2715_v5  ;;  %742 = vmatpush2.bf16.msra.mxu1 %v2712_v3 }
  0x41   :  { %807 = vmatprep.subr.bf16.mxu1 %v2760_v12 }
  0x42   :  { %703 = vmatmul.mubr.bf16.vlgmr.msra.gmra.mxu0 %v59_v7 }
  0x43   :  { %753 = vmatpush1.bf16.msra.mxu0 %v2713_v8  ;;  %744 = vmatmul.mubr.bf16.vlgmr.msra.gmra.mxu1 %v61_v10 }
  0x44   :  { %754 = vmatprep.subr.bf16.mxu0 %v2718_v9  ;;  %808 = vmatpush1.bf16.msra.mxu1 %v2758_v11 }
  0x45   :  { %825 = vmatprep.mubr.bf16.mxu1 %v3008_v19  ;;  %784 = vmatprep.mubr.bf16.mxu0 %v64_v17 }
  0x47   :  { %755 = vmatpush1.bf16.msra.mxu0 %v2716_v13 }
  0x48   :  { %756 = vmatprep.subr.bf16.mxu0 %v2721_v14 }
  0x4b   :  { %757 = vmatpush1.bf16.msra.mxu0 %v2719_v18  ;;  %2368 = vmatmul.mubr.msk.bf16.vlgmr.msra.gmra.mxu1 %vm666_vm0, %v65_v21 }
  0x4c   :  { %758 = vmatprep.subr.bf16.mxu0 %v2724_v20 }
  0x4f   :  { %759 = vmatpush1.bf16.msra.mxu0 %v2722_v22 }
  0x50   :  { %760 = vmatprep.subr.bf16.mxu0 %v2727_v23 }
  0x53   :  { %761 = vmatpush1.bf16.msra.mxu0 %v2725_v24 }
  0x54   :  { %762 = vmatprep.subr.bf16.mxu0 %v2730_v25 }
  0x57   :  { %763 = vmatpush1.bf16.msra.mxu0 %v2728_v26 }
  0x58   :  { %764 = vmatprep.subr.bf16.mxu0 %v2733_v27 }
  0x5b   :  { %765 = vmatpush1.bf16.msra.mxu0 %v2731_v28 }
  0x5c   :  { %766 = vmatprep.subr.bf16.mxu0 %v2736_v29 }
  0x5f   :  { %767 = vmatpush1.bf16.msra.mxu0 %v2734_v30 }
  0x60   :  { %768 = vmatprep.subr.bf16.mxu0 %v2739_v31 }
  0x63   :  { %769 = vmatpush2.bf16.msra.mxu0 %v2737_v32 }
  0x64   :  { %770 = vmatprep.subr.bf16.mxu0 %v2742_v33 }
  0x67   :  { %771 = vmatpush2.bf16.msra.mxu0 %v2740_v34 }
  0x68   :  { %772 = vmatprep.subr.bf16.mxu0 %v2745_v35 }
  0x6b   :  { %773 = vmatpush2.bf16.msra.mxu0 %v2743_v36 }
  0x6c   :  { %774 = vmatprep.subr.bf16.mxu0 %v2748_v37 }
  0x6f   :  { %775 = vmatpush2.bf16.msra.mxu0 %v2746_v38 }
  0x70   :  { %776 = vmatprep.subr.bf16.mxu0 %v2751_v39 }
  0x73   :  { %777 = vmatpush2.bf16.msra.mxu0 %v2749_v40 }
  0x74   :  { %778 = vmatprep.subr.bf16.mxu0 %v2754_v41 }
  0x77   :  { %779 = vmatpush2.bf16.msra.mxu0 %v2752_v42 }
  0x78   :  { %780 = vmatprep.subr.bf16.mxu0 %v2757_v43 }
  0x7b   :  { %781 = vmatpush2.bf16.msra.mxu0 %v2755_v44 }
  0x7c   :  { %782 = vmatprep.subr.bf16.mxu0 %v2763_v45 }
  0x7f   :  { %783 = vmatpush2.bf16.msra.mxu0 %v2761_v46 }
  0x82   :  { %785 = vmatmul.mubr.bf16.vlgmr.msra.gmra.mxu0 %v63_v48 }
  0x83   :  { %22 = vsyncpa [#allocation5], 0  ;;  %v2764_v49 = vld [vmem:[%s3930_s4 + $0x78] sm:$0xff]   ;;  %v2766_v51 = vld [vmem:[%s3930_s4 + $0x70] sm:$0xff]   ;;  %v3009_v1 = vmov 0.0   ;;  %v166_v14 = vlaneseq  ;;  %vm3010_vm1 = vmmov 0  }
  0x84   :  { %v2765_v50 = vld [vmem:[%s3930_s4 + $0x38] sm:$0xff]   ;;  %2522 = vmatprep.subr.bf16.mxu1 %v2764_v49  ;;  %v2767_v52 = vld [vmem:[%s3930_s4 + $0x30] sm:$0xff]   ;;  %v2768_v53 = vld [vmem:[%s3930_s4 + $0x68] sm:$0xff]   ;;  %vm1054_vm2 = vcmask 523264  }
  0x85   :  { %2523 = vmatpush3.bf16.msra.mxu1 %v2765_v50  ;;  %v2769_v54 = vld [vmem:[%s3930_s4 + $0x28] sm:$0xff]   ;;  %v2770_v55 = vld [vmem:[%s3930_s4 + $0x60] sm:$0xff]   ;;  %v2772_v57 = vld [vmem:[%s3930_s4 + $0x58] sm:$0xff]   ;;  %v3459_v15 = vshrl.u32 %v166_v14, 7 }
  0x86   :  { %2524 = vmatprep.subr.bf16.mxu1 %v2766_v51  ;;  %v2771_v56 = vld [vmem:[%s3930_s4 + $0x20] sm:$0xff]   ;;  %v2773_v58 = vld [vmem:[%s3930_s4 + $0x18] sm:$0xff]   ;;  %v2774_v59 = vld [vmem:[%s3930_s4 + $0x50] sm:$0xff]  }
  0x87   :  { %v2775_v60 = vld [vmem:[%s3930_s4 + $0x10] sm:$0xff]   ;;  %v2776_v61 = vld [vmem:[%s3930_s4 + $0x48] sm:$0xff]   ;;  %v2778_v63 = vld [vmem:[%s3930_s4 + $0x40] sm:$0xff]   ;;  %v3462_v16 = vsub.s32 0, %v3459_v15  ;;  %v3468_v18 = vsub.s32 1, %v3459_v15 }
  0x88   :  { %v2777_v62 = vld [vmem:[%s3930_s4 + $0x8] sm:$0xff]   ;;  %v2779_v0 = vld [vmem:[%s3930_s4] sm:$0xff]   ;;  %v2780_v37 = vld [vmem:[%s3932_s6 + $0x18] sm:$0xff]  }
  0x89   :  { %2525 = vmatpush3.bf16.msra.mxu1 %v2767_v52  ;;  %v164_v17 = vld [vmem:[%s3929_s3] sm:$0x3]  ;;  %v2781_v39 = vld [vmem:[%s3932_s6 + $0x10] sm:$0xff]   ;;  %v2782_v40 = vld [vmem:[%s3932_s6 + $0x8] sm:$0xff]  }
  0x8a   :  { %2526 = vmatprep.subr.bf16.mxu1 %v2768_v53  ;;  %v169_v20 = vrot.slane %v164_v17, %v3462_v16  ;;  %v173_v21 = vrot.slane %v164_v17, %v3468_v18  ;;  %v2783_v41 = vld [vmem:[%s3932_s6] sm:$0xff]   ;;  %v2784_v50 = vld [vmem:[%s3934_s8 + $0x38] sm:$0xff]   ;;  %v2785_v52 = vld [vmem:[%s3934_s8 + $0x30] sm:$0xff]  }
  0x8b   :  { %v2369_v43 = vld [vmem:[%s3931_s5] ss:$0 sm:$0xff]  ;;  %v2786_v53 = vld [vmem:[%s3934_s8 + $0x28] sm:$0xff]   ;;  %v2809_v14 = vld [vmem:[%s3938_s12 + $0x194] ss:$28 sps:$4 sm:$0xff]  }
  0x8c   :  { %v2812_v17 = vld [vmem:[%s3938_s12 + $0x154] ss:$28 sps:$4 sm:$0xff]  }
  0x8d   :  { %2527 = vmatpush3.bf16.msra.mxu1 %v2769_v54  ;;  %v2787_v54 = vld [vmem:[%s3934_s8 + $0x20] sm:$0xff]  }
  0x8e   :  { %2528 = vmatprep.subr.bf16.mxu1 %v2770_v55  ;;  %v2788_v55 = vld [vmem:[%s3934_s8 + $0x18] sm:$0xff]  }
  0x91   :  { %2529 = vmatpush3.bf16.msra.mxu1 %v2771_v56  ;;  %v2789_v56 = vld [vmem:[%s3934_s8 + $0x10] sm:$0xff]  }
  0x92   :  { %2530 = vmatprep.subr.bf16.mxu1 %v2772_v57  ;;  %v2790_v57 = vld [vmem:[%s3934_s8 + $0x8] sm:$0xff]  }
  0x95   :  { %2531 = vmatpush3.bf16.msra.mxu1 %v2773_v58  ;;  %v2791_v58 = vld [vmem:[%s3934_s8] sm:$0xff]  }
  0x96   :  { %2532 = vmatprep.subr.bf16.mxu1 %v2774_v59  ;;  %v2794_v59 = vld [vmem:[%s3936_s10 + $0x34] ss:$8 sps:$4 sm:$0xff]  }
  0x99   :  { %2533 = vmatpush3.bf16.msra.mxu1 %v2775_v60  ;;  %v2386_v60 = vld [vmem:[%s3933_s7] ss:$0 sm:$0xff] }
  0x9a   :  { %2534 = vmatprep.subr.bf16.mxu1 %v2776_v61 }
  0x9d   :  { %2535 = vmatpush3.bf16.msra.mxu1 %v2777_v62 }
  0x9e   :  { %2536 = vmatprep.subr.bf16.mxu1 %v2778_v63  ;;  %v1099_v63 = vld [vmem:[%s3927_s1] sm:$0xff]  ;;  %s3011_s1 = smov [#allocation2]  }
  0x9f   :  { %s2248_s27 = sshll.u32 %s3011_s1, 4  ;;  %s2249_s27 = int_to_ptr.vmem [resolvable:$true] %s2248_s27 }
  0xa0   :  { %s2964_s28 = scalar_lea.vmem %s2249_s27, 128  ;;  %p2969_p1 = scmp.lt.s32.totalorder %s2249_s27, %s2249_s27 }
  0xa1   :  { %2537 = vmatpush3.bf16.msra.mxu1 %v2779_v0  ;;  %p2965_p0 = scmp.ne.s32.totalorder %s2249_s27, %s2964_s28  ;;  %p2970_p2 = scmp.lt.s32.totalorder %s2964_s28, %s2964_s28 }
  0xa2   :  { %2580 = vmatprep.subr.bf16.mxu1 %v3009_v1 }
  0xa3   :  { %p2971_p3 = por %p2970_p2, %p2969_p1 }
  0xa5   :  { %p2972_p4 = pnand %p2971_p3, %p2965_p0 }
 0x102   :  { %v704_v2 = vpop.f32.mrf.mxu0 }
 0x103   :  { %v745_v4 = vpop.f32.mrf.mxu1  ;;  %v705_v22 = vadd.f32 %v704_v2, %v169_v20  ;;  %v2810_v20 = vld [vmem:[%s3938_s12 + $0x150] ss:$28 sps:$4 sm:$0xff]  }
 0x104   :  { %v706_v3 = vpop.f32.mrf.mxu0 }
 0x105   :  { %v747_v6 = vpop.f32.mrf.mxu1  ;;  %v707_v23 = vadd.f32 %v706_v3, %v173_v21  ;;  %v746_v24 = vadd.f32 %v745_v4, %v705_v22  ;;  %v2818_v21 = vld [vmem:[%s3938_s12 + $0x11c] ss:$28 sps:$4 sm:$0xff]  }
 0x106   :  { %v708_v5 = vpop.f32.mrf.mxu0  ;;  %v2816_v22 = vld [vmem:[%s3938_s12 + $0x118] ss:$28 sps:$4 sm:$0xff]  }
 0x107   :  { %v749_v8 = vpop.f32.mrf.mxu1  ;;  %v748_v26 = vadd.f32 %v747_v6, %v707_v23  ;;  %v2792_v5 = vld [vmem:[%s3936_s10 + $0x30] ss:$8 sps:$4 sm:$0xff]   ;;  %v2824_v23 = vld [vmem:[%s3938_s12 + $0xe4] ss:$28 sps:$4 sm:$0xff]  }
 0x108   :  { %v709_v7 = vpop.f32.mrf.mxu0  ;;  %v2795_v8 = vld [vmem:[%s3936_s10 + $0x20] ss:$8 sps:$4 sm:$0xff]  }
 0x109   :  { %v750_v9 = vpop.f32.mrf.mxu1  ;;  %v2797_v7 = vld [vmem:[%s3936_s10 + $0x24] ss:$8 sps:$4 sm:$0xff]  }
 0x10a   :  { %v2800_v9 = vld [vmem:[%s3936_s10 + $0x14] ss:$8 sps:$4 sm:$0xff]  }
 0x10b   :  { %v827_v10 = vpop.f32.mrf.mxu1 }
 0x10d   :  { %v829_v11 = vpop.f32.mrf.mxu1 }
 0x10f   :  { %v831_v12 = vpop.f32.mrf.mxu1 }
 0x110   :  { %v2804_v12 = vld [vmem:[%s3938_s12 + $0x188] ss:$28 sps:$4 sm:$0xff]  }
 0x111   :  { %v832_v13 = vpop.f32.mrf.mxu1 }
 0x112   :  { %v2806_v13 = vld [vmem:[%s3938_s12 + $0x18c] ss:$28 sps:$4 sm:$0xff]  }
 0x113   :  { %2065 = vmatprep.subr.bf16.mxu0 %v2806_v13  ;;  %v2887_v13 = vld [vmem:[%s3938_s12 + $0x23c] ss:$28 sps:$4 sm:$0xff]  }
 0x114   :  { %2066 = vmatpush1.bf16.msra.mxu0 %v2804_v12  ;;  %v2879_v12 = vld [vmem:[%s3938_s12 + $0x270] ss:$28 sps:$4 sm:$0xff]  }
 0x115   :  { %2067 = vmatprep.subr.bf16.mxu0 %v2812_v17  ;;  %v2890_v17 = vld [vmem:[%s3938_s12 + $0x1fc] ss:$28 sps:$4 sm:$0xff]  }
 0x118   :  { %2068 = vmatpush1.bf16.msra.mxu0 %v2810_v20  ;;  %v2893_v20 = vld [vmem:[%s3938_s12 + $0x204] ss:$28 sps:$4 sm:$0xff]  }
 0x119   :  { %2069 = vmatprep.subr.bf16.mxu0 %v2818_v21  ;;  %v2888_v21 = vld [vmem:[%s3938_s12 + $0x1f8] ss:$28 sps:$4 sm:$0xff]  }
 0x11c   :  { %2070 = vmatpush1.bf16.msra.mxu0 %v2816_v22  ;;  %v2891_v22 = vld [vmem:[%s3938_s12 + $0x200] ss:$28 sps:$4 sm:$0xff]  }
 0x11d   :  { %2071 = vmatprep.subr.bf16.mxu0 %v2824_v23  ;;  %v2896_v23 = vld [vmem:[%s3938_s12 + $0x1c4] ss:$28 sps:$4 sm:$0xff]  }
 0x142   :  { %v786_v25 = vpop.f32.mrf.mxu0 }
 0x143   :  { %v787_v27 = vadd.f32 %v786_v25, %v746_v24  ;;  %v2822_v24 = vld [vmem:[%s3938_s12 + $0xe0] ss:$28 sps:$4 sm:$0xff]   ;;  %v2830_v25 = vld [vmem:[%s3938_s12 + $0xac] ss:$28 sps:$4 sm:$0xff]  }
 0x144   :  { %v788_v28 = vpop.f32.mrf.mxu0  ;;  %2072 = vmatpush1.bf16.msra.mxu0 %v2822_v24  ;;  %v2899_v24 = vld [vmem:[%s3938_s12 + $0x1cc] ss:$28 sps:$4 sm:$0xff]  }
 0x145   :  { %v828_v29 = vadd.f32 %v827_v10, %v787_v27  ;;  %v789_v30 = vadd.f32 %v788_v28, %v748_v26  ;;  %v2798_v10 = vld [vmem:[%s3936_s10 + $0x10] ss:$8 sps:$4 sm:$0xff]   ;;  %v2828_v26 = vld [vmem:[%s3938_s12 + $0xa8] ss:$28 sps:$4 sm:$0xff]   ;;  %2073 = vmatprep.subr.bf16.mxu0 %v2830_v25  ;;  %v2894_v25 = vld [vmem:[%s3938_s12 + $0x1c0] ss:$28 sps:$4 sm:$0xff]  }
 0x146   :  { %v790_v31 = vpop.f32.mrf.mxu0  ;;  %v2836_v27 = vld [vmem:[%s3938_s12 + $0x74] ss:$28 sps:$4 sm:$0xff]  }
 0x147   :  { %v830_v32 = vadd.f32 %v829_v11, %v789_v30  ;;  %v834_v33 = vmax.f32 %v828_v29, 0.0  ;;  %v2803_v11 = vld [vmem:[%s3936_s10 + $0x4] ss:$8 sps:$4 sm:$0xff]   ;;  %v2842_v29 = vld [vmem:[%s3938_s12 + $0x3c] ss:$28 sps:$4 sm:$0xff]  }
 0x148   :  { %v791_v34 = vpop.f32.mrf.mxu0  ;;  %2074 = vmatpush1.bf16.msra.mxu0 %v2828_v26  ;;  %v2834_v28 = vld [vmem:[%s3938_s12 + $0x70] ss:$28 sps:$4 sm:$0xff]   ;;  %v2840_v30 = vld [vmem:[%s3938_s12 + $0x38] ss:$28 sps:$4 sm:$0xff]   ;;  %v2848_v31 = vld [vmem:[%s3938_s12 + $0x4] ss:$28 sps:$4 sm:$0xff]  }
 0x149   :  { %v835_v35 = vmax.f32 %v830_v32, 0.0  ;;  %v836_v38 = vpack.c.bf16 %v834_v33, %v834_v33  ;;  %2075 = vmatprep.subr.bf16.mxu0 %v2836_v27  ;;  %v2846_v32 = vld [vmem:[%s3938_s12] ss:$28 sps:$4 sm:$0xff]   ;;  %v2854_v33 = vld [vmem:[%s3938_s12 + $0x34c] ss:$28 sps:$4 sm:$0xff]  }
 0x14a   :  { %v2852_v34 = vld [vmem:[%s3938_s12 + $0x348] ss:$28 sps:$4 sm:$0xff]   ;;  %v2902_v27 = vld [vmem:[%s3938_s12 + $0x19c] ss:$28 sps:$4 sm:$0xff]  }
 0x14b   :  { %v837_v36 = vpack.c.bf16 %v835_v35, %v835_v35  ;;  %v2860_v35 = vld [vmem:[%s3938_s12 + $0x314] ss:$28 sps:$4 sm:$0xff]   ;;  %v2897_v26 = vld [vmem:[%s3938_s12 + $0x1c8] ss:$28 sps:$4 sm:$0xff]  }
 0x14c   :  { %2076 = vmatpush1.bf16.msra.mxu0 %v2834_v28  ;;  %v2903_v28 = vld [vmem:[%s3938_s12 + $0x360] ss:$28 sps:$4 sm:$0xff]  }
 0x14d   :  { %1005 = vmatprep.mubr.bf16.mxu1 %v837_v36  ;;  %2077 = vmatprep.subr.bf16.mxu0 %v2842_v29  ;;  %v2858_v36 = vld [vmem:[%s3938_s12 + $0x310] ss:$28 sps:$4 sm:$0xff]   ;;  %v1224_v29 = vld [vmem:[%s3937_s11] sm:$0x3] }
 0x14e   :  { %1006 = vmatmul.mubr.bf16.vlgmr.msra.gmra.mxu1 %v836_v38  ;;  %v2864_v38 = vld [vmem:[%s3938_s12 + $0x2d8] ss:$28 sps:$4 sm:$0xff]  }
 0x14f   :  { %2581 = vmatpush3.bf16.msra.mxu1 %v2780_v37  ;;  %2588 = vmatprep.mubr.msk.bf16.mxu1 %vm3010_vm1, %v3009_v1  ;;  %v2866_v37 = vld [vmem:[%s3938_s12 + $0x2dc] ss:$28 sps:$4 sm:$0xff]  }
 0x150   :  { %2582 = vmatprep.subr.bf16.mxu1 %v3009_v1  ;;  %2078 = vmatpush1.bf16.msra.mxu0 %v2840_v30  ;;  %v1229_v30 = vrot.slane %v1224_v29, %v3462_v16 }
 0x151   :  { %2079 = vmatprep.subr.bf16.mxu0 %v2848_v31  ;;  %v1233_v31 = vrot.slane %v1224_v29, %v3468_v18 }
 0x153   :  { %2583 = vmatpush3.bf16.msra.mxu1 %v2781_v39  ;;  %v2872_v39 = vld [vmem:[%s3938_s12 + $0x2a4] ss:$28 sps:$4 sm:$0xff]  }
 0x154   :  { %2584 = vmatprep.subr.bf16.mxu1 %v3009_v1  ;;  %2080 = vmatpush1.bf16.msra.mxu0 %v2846_v32 }
 0x155   :  { %2081 = vmatprep.subr.bf16.mxu0 %v2854_v33 }
 0x157   :  { %2585 = vmatpush3.bf16.msra.mxu1 %v2782_v40  ;;  %v2870_v40 = vld [vmem:[%s3938_s12 + $0x2a0] ss:$28 sps:$4 sm:$0xff]  }
 0x158   :  { %2586 = vmatprep.subr.bf16.mxu1 %v3009_v1  ;;  %2082 = vmatpush2.bf16.msra.mxu0 %v2852_v34 }
 0x159   :  { %2083 = vmatprep.subr.bf16.mxu0 %v2860_v35 }
 0x15b   :  { %2587 = vmatpush3.bf16.msra.mxu1 %v2783_v41  ;;  %v2878_v41 = vld [vmem:[%s3938_s12 + $0x26c] ss:$28 sps:$4 sm:$0xff]  }
 0x15c   :  { %2592 = vmatprep.subr.bf16.mxu1 %v3009_v1  ;;  %2084 = vmatpush2.bf16.msra.mxu0 %v2858_v36 }
 0x15d   :  { %2085 = vmatprep.subr.bf16.mxu0 %v2866_v37 }
 0x160   :  { %2086 = vmatpush2.bf16.msra.mxu0 %v2864_v38 }
 0x161   :  { %2087 = vmatprep.subr.bf16.mxu0 %v2872_v39 }
 0x164   :  { %2088 = vmatpush2.bf16.msra.mxu0 %v2870_v40 }
 0x165   :  { %2089 = vmatprep.subr.bf16.mxu0 %v2878_v41  ;;  %v2900_v41 = vld [vmem:[%s3938_s12 + $0x198] ss:$28 sps:$4 sm:$0xff]  }
 0x20e   :  { %v2538_v42 = vpop.f32.mrf.mxu1 }
 0x210   :  { %v2539_v44 = vpop.f32.mrf.mxu1 }
 0x211   :  { %v2540_v45 = vadd.f32 %v2539_v44, %v2538_v42  ;;  %v2876_v42 = vld [vmem:[%s3938_s12 + $0x268] ss:$28 sps:$4 sm:$0xff]   ;;  %v2882_v44 = vld [vmem:[%s3938_s12 + $0x230] ss:$28 sps:$4 sm:$0xff]  }
 0x212   :  { %v2541_v46 = vpop.f32.mrf.mxu1  ;;  %2090 = vmatpush2.bf16.msra.mxu0 %v2876_v42  ;;  %v2904_v42 = vld [vmem:[%s3938_s12 + $0x1a0] ss:$28 sps:$4 sm:$0xff]  }
 0x213   :  { %v1008_v47 = vadd.f32 %v2540_v45, %v2369_v43  ;;  %v2884_v43 = vld [vmem:[%s3938_s12 + $0x234] ss:$28 sps:$4 sm:$0xff]   ;;  %v2392_v45 = vld [vmem:[%s3935_s9] ss:$0 sm:$0xff] }
 0x214   :  { %v2542_v48 = vpop.f32.mrf.mxu1  ;;  %2091 = vmatprep.subr.bf16.mxu0 %v2884_v43 }
 0x215   :  { %v1013_v49 = vmax.f32 %v1008_v47, 0.0 }
 0x216   :  { %2092 = vmatpush2.bf16.msra.mxu0 %v2882_v44  ;;  %v2907_v44 = vld [vmem:[%s3938_s12 + $0x164] ss:$28 sps:$4 sm:$0xff]  }
 0x217   :  { %v1014_v51 = vpack.c.bf16 %v1013_v49, %v1013_v49  ;;  %2093 = vmatprep.subr.bf16.mxu0 %v2890_v17  ;;  %v2954_v17 = vld [vmem:[%s3938_s12 + $0x27c] ss:$28 sps:$4 sm:$0xff]  }
 0x219   :  { %2589 = vmatmul.mubr.msk.bf16.vlgmr.msra.gmra.mxu1 %vm1054_vm2, %v1014_v51  ;;  %v2807_v51 = vld [vmem:[%s3938_s12 + $0x190] ss:$28 sps:$4 sm:$0xff]  }
 0x21a   :  { %2593 = vmatpush3.bf16.msra.mxu1 %v2784_v50  ;;  %2608 = vmatprep.mubr.msk.bf16.mxu1 %vm3010_vm1, %v3009_v1 }
 0x21b   :  { %2594 = vmatprep.subr.bf16.mxu1 %v3009_v1  ;;  %2094 = vmatpush2.bf16.msra.mxu0 %v2888_v21  ;;  %v2957_v21 = vld [vmem:[%s3938_s12 + $0x244] ss:$28 sps:$4 sm:$0xff]  }
 0x21c   :  { %2095 = vmatprep.subr.bf16.mxu0 %v2896_v23  ;;  %v2960_v23 = vld [vmem:[%s3938_s12 + $0x20c] ss:$28 sps:$4 sm:$0xff]  }
 0x21e   :  { %2595 = vmatpush3.bf16.msra.mxu1 %v2785_v52 }
 0x21f   :  { %2596 = vmatprep.subr.bf16.mxu1 %v3009_v1  ;;  %2096 = vmatpush2.bf16.msra.mxu0 %v2894_v25  ;;  %v2963_v25 = vld [vmem:[%s3938_s12 + $0x1d4] ss:$28 sps:$4 sm:$0xff]  }
 0x220   :  { %2147 = vmatprep.subr.bf16.mxu0 %v2902_v27 }
 0x222   :  { %2597 = vmatpush3.bf16.msra.mxu1 %v2786_v53  ;;  %v2815_v53 = vld [vmem:[%s3938_s12 + $0x15c] ss:$28 sps:$4 sm:$0xff]  }
 0x223   :  { %2598 = vmatprep.subr.bf16.mxu1 %v3009_v1 }
 0x226   :  { %2599 = vmatpush3.bf16.msra.mxu1 %v2787_v54 }
 0x227   :  { %2600 = vmatprep.subr.bf16.mxu1 %v3009_v1 }
 0x22a   :  { %2601 = vmatpush3.bf16.msra.mxu1 %v2788_v55  ;;  %v2813_v55 = vld [vmem:[%s3938_s12 + $0x158] ss:$28 sps:$4 sm:$0xff]  }
 0x22b   :  { %2602 = vmatprep.subr.bf16.mxu1 %v3009_v1 }
 0x22e   :  { %2603 = vmatpush3.bf16.msra.mxu1 %v2789_v56  ;;  %v2821_v56 = vld [vmem:[%s3938_s12 + $0x124] ss:$28 sps:$4 sm:$0xff]  }
 0x22f   :  { %2604 = vmatprep.subr.bf16.mxu1 %v3009_v1 }
 0x232   :  { %2605 = vmatpush3.bf16.msra.mxu1 %v2790_v57  ;;  %v2819_v57 = vld [vmem:[%s3938_s12 + $0x120] ss:$28 sps:$4 sm:$0xff]  }
 0x233   :  { %2606 = vmatprep.subr.bf16.mxu1 %v3009_v1 }
 0x236   :  { %2607 = vmatpush3.bf16.msra.mxu1 %v2791_v58  ;;  %v2827_v58 = vld [vmem:[%s3938_s12 + $0xec] ss:$28 sps:$4 sm:$0xff]  }
 0x237   :  { %1287 = vmatprep.subr.bf16.mxu1 %v2794_v59  ;;  %v2825_v59 = vld [vmem:[%s3938_s12 + $0xe8] ss:$28 sps:$4 sm:$0xff]  }
 0x2d9   :  { %v1092_v61 = vpop.f32.mrf.mxu1 }
 0x2da   :  { %v1093_v62 = vadd.f32 %v2386_v60, %v1092_v61  ;;  %v2833_v60 = vld [vmem:[%s3938_s12 + $0xb4] ss:$28 sps:$4 sm:$0xff]  }
 0x2db   :  { %v2590_v0 = vpop.f32.mrf.mxu1  ;;  %v2831_v61 = vld [vmem:[%s3938_s12 + $0xb0] ss:$28 sps:$4 sm:$0xff]  }
 0x2dc   :  { %v1098_v1 = vmax.f32 %v1093_v62, 0.0  ;;  %v2839_v62 = vld [vmem:[%s3938_s12 + $0x7c] ss:$28 sps:$4 sm:$0xff]   ;;  %v2845_v0 = vld [vmem:[%s3938_s12 + $0x44] ss:$28 sps:$4 sm:$0xff]  }
 0x2dd   :  { %v1095_v2 = vpop.f32.mrf.mxu1 }
 0x2de   :  { %v1100_v3 = vmul.f32 %v1099_v63, %v1098_v1  ;;  %v2837_v63 = vld [vmem:[%s3938_s12 + $0x78] ss:$28 sps:$4 sm:$0xff]   ;;  %v2843_v1 = vld [vmem:[%s3938_s12 + $0x40] ss:$28 sps:$4 sm:$0xff]   ;;  %v2851_v2 = vld [vmem:[%s3938_s12 + $0xc] ss:$28 sps:$4 sm:$0xff]  }
 0x2df   :  { %v2591_v4 = vpop.f32.mrf.mxu1 }
 0x2e0   :  { %v1102_v6 = vpack.c.bf16 %v1100_v3, %v1100_v3  ;;  %1101 = vst [vmem:[#allocation2] sm:$0xff] %v1100_v3  ;;  %v2849_v3 = vld [vmem:[%s3938_s12 + $0x8] ss:$28 sps:$4 sm:$0xff]   ;;  %v2857_v4 = vld [vmem:[%s3938_s12 + $0x354] ss:$28 sps:$4 sm:$0xff]  }
 0x2e2   :  { %2609 = vmatmul.mubr.bf16.vlgmr.msra.gmra.mxu1 %v1102_v6  ;;  %v2863_v6 = vld [vmem:[%s3938_s12 + $0x31c] ss:$28 sps:$4 sm:$0xff]  }
 0x2e3   :  { %1288 = vmatpush1.bf16.msra.mxu1 %v2792_v5  ;;  %1311 = vmatprep.mubr.bf16.mxu1 %v3008_v19  ;;  %v2801_v19 = vld [vmem:[%s3936_s10] ss:$8 sps:$4 sm:$0xff]   ;;  %v2855_v5 = vld [vmem:[%s3938_s12 + $0x350] ss:$28 sps:$4 sm:$0xff]  }
 0x2e4   :  { %1289 = vmatprep.subr.bf16.mxu1 %v2797_v7  ;;  %v2861_v7 = vld [vmem:[%s3938_s12 + $0x318] ss:$28 sps:$4 sm:$0xff]  }
 0x2e7   :  { %1290 = vmatpush1.bf16.msra.mxu1 %v2795_v8  ;;  %v2869_v8 = vld [vmem:[%s3938_s12 + $0x2e4] ss:$28 sps:$4 sm:$0xff]  }
 0x2e8   :  { %1291 = vmatprep.subr.bf16.mxu1 %v2800_v9  ;;  %v2867_v9 = vld [vmem:[%s3938_s12 + $0x2e0] ss:$28 sps:$4 sm:$0xff]  }
 0x2eb   :  { %1292 = vmatpush1.bf16.msra.mxu1 %v2798_v10  ;;  %v2875_v10 = vld [vmem:[%s3938_s12 + $0x2ac] ss:$28 sps:$4 sm:$0xff]  }
 0x2ec   :  { %1293 = vmatprep.subr.bf16.mxu1 %v2803_v11  ;;  %v2873_v11 = vld [vmem:[%s3938_s12 + $0x2a8] ss:$28 sps:$4 sm:$0xff]  }
 0x2ef   :  { %1294 = vmatpush1.bf16.msra.mxu1 %v2801_v19  ;;  %v2881_v19 = vld [vmem:[%s3938_s12 + $0x274] ss:$28 sps:$4 sm:$0xff]  }
 0x2f0   :  { %2106 = vmatprep.subr.bf16.mxu1 %v2809_v14  ;;  %v2885_v14 = vld [vmem:[%s3938_s12 + $0x238] ss:$28 sps:$4 sm:$0xff]  }
 0x3a2   :  { %v1208_v46 = vpop.f32.mrf.mxu1 }
 0x3a3   :  { %v1209_v47 = vadd.f32 %v2392_v45, %v1208_v46  ;;  %v2908_v45 = vld [vmem:[%s3938_s12 + $0x328] ss:$28 sps:$4 sm:$0xff]   ;;  %v2905_v46 = vld [vmem:[%s3938_s12 + $0x160] ss:$28 sps:$4 sm:$0xff]  }
 0x3a4   :  { %v2610_v48 = vpop.f32.mrf.mxu1 }
 0x3a5   :  { %v1214_v49 = vmax.f32 %v1209_v47, 0.0  ;;  %v2909_v47 = vld [vmem:[%s3938_s12 + $0x168] ss:$28 sps:$4 sm:$0xff]  }
 0x3a6   :  { %v1211_v50 = vpop.f32.mrf.mxu1  ;;  %v2912_v48 = vld [vmem:[%s3938_s12 + $0x12c] ss:$28 sps:$4 sm:$0xff]  }
 0x3a7   :  { %v1215_v52 = vpack.c.bf16 %v1214_v49, %v1214_v49  ;;  %v2913_v49 = vld [vmem:[%s3938_s12 + $0x2f0] ss:$28 sps:$4 sm:$0xff]   ;;  %v2910_v50 = vld [vmem:[%s3938_s12 + $0x128] ss:$28 sps:$4 sm:$0xff]  }
 0x3a8   :  { %v2611_v54 = vpop.f32.mrf.mxu1 }
 0x3a9   :  { %2409 = vmatmul.mubr.msk.bf16.vlgmr.msra.gmra.mxu1 %vm1054_vm2, %v1215_v52  ;;  %v2917_v52 = vld [vmem:[%s3938_s12 + $0xf4] ss:$28 sps:$4 sm:$0xff]  }
 0x3aa   :  { %2107 = vmatpush1.bf16.msra.mxu1 %v2807_v51  ;;  %v2914_v51 = vld [vmem:[%s3938_s12 + $0x130] ss:$28 sps:$4 sm:$0xff]  }
 0x3ab   :  { %2108 = vmatprep.subr.bf16.mxu1 %v2815_v53  ;;  %v2918_v53 = vld [vmem:[%s3938_s12 + $0x2b8] ss:$28 sps:$4 sm:$0xff]   ;;  %v2915_v54 = vld [vmem:[%s3938_s12 + $0xf0] ss:$28 sps:$4 sm:$0xff]  }
 0x3ae   :  { %2109 = vmatpush1.bf16.msra.mxu1 %v2813_v55  ;;  %v2919_v55 = vld [vmem:[%s3938_s12 + $0xf8] ss:$28 sps:$4 sm:$0xff]  }
 0x3af   :  { %2110 = vmatprep.subr.bf16.mxu1 %v2821_v56  ;;  %v2922_v56 = vld [vmem:[%s3938_s12 + $0xbc] ss:$28 sps:$4 sm:$0xff]  }
 0x3b2   :  { %2111 = vmatpush1.bf16.msra.mxu1 %v2819_v57  ;;  %v2923_v57 = vld [vmem:[%s3938_s12 + $0x280] ss:$28 sps:$4 sm:$0xff]  }
 0x3b3   :  { %2112 = vmatprep.subr.bf16.mxu1 %v2827_v58  ;;  %v2920_v58 = vld [vmem:[%s3938_s12 + $0xb8] ss:$28 sps:$4 sm:$0xff]  }
 0x3b6   :  { %2113 = vmatpush1.bf16.msra.mxu1 %v2825_v59  ;;  %v2924_v59 = vld [vmem:[%s3938_s12 + $0xc0] ss:$28 sps:$4 sm:$0xff]  }
 0x3b7   :  { %2114 = vmatprep.subr.bf16.mxu1 %v2833_v60  ;;  %v2927_v60 = vld [vmem:[%s3938_s12 + $0x84] ss:$28 sps:$4 sm:$0xff]  }
 0x3ba   :  { %2115 = vmatpush1.bf16.msra.mxu1 %v2831_v61  ;;  %v2928_v61 = vld [vmem:[%s3938_s12 + $0x248] ss:$28 sps:$4 sm:$0xff]  }
 0x3bb   :  { %2116 = vmatprep.subr.bf16.mxu1 %v2839_v62  ;;  %v2925_v62 = vld [vmem:[%s3938_s12 + $0x80] ss:$28 sps:$4 sm:$0xff]  }
 0x3be   :  { %2117 = vmatpush1.bf16.msra.mxu1 %v2837_v63  ;;  %v2929_v63 = vld [vmem:[%s3938_s12 + $0x88] ss:$28 sps:$4 sm:$0xff]  }
 0x3bf   :  { %2118 = vmatprep.subr.bf16.mxu1 %v2845_v0  ;;  %v2932_v0 = vld [vmem:[%s3938_s12 + $0x4c] ss:$28 sps:$4 sm:$0xff]  }
 0x3c2   :  { %2119 = vmatpush1.bf16.msra.mxu1 %v2843_v1  ;;  %v2933_v1 = vld [vmem:[%s3938_s12 + $0x210] ss:$28 sps:$4 sm:$0xff]  }
 0x3c3   :  { %2120 = vmatprep.subr.bf16.mxu1 %v2851_v2  ;;  %v2930_v2 = vld [vmem:[%s3938_s12 + $0x48] ss:$28 sps:$4 sm:$0xff]  }
 0x3c6   :  { %2121 = vmatpush1.bf16.msra.mxu1 %v2849_v3  ;;  %v2934_v3 = vld [vmem:[%s3938_s12 + $0x50] ss:$28 sps:$4 sm:$0xff]  }
 0x3c7   :  { %2122 = vmatprep.subr.bf16.mxu1 %v2857_v4  ;;  %v2937_v4 = vld [vmem:[%s3938_s12 + $0x14] ss:$28 sps:$4 sm:$0xff]  }
 0x3ca   :  { %2123 = vmatpush2.bf16.msra.mxu1 %v2855_v5  ;;  %v2938_v5 = vld [vmem:[%s3938_s12 + $0x1d8] ss:$28 sps:$4 sm:$0xff]  }
 0x3cb   :  { %2124 = vmatprep.subr.bf16.mxu1 %v2863_v6  ;;  %v2935_v6 = vld [vmem:[%s3938_s12 + $0x10] ss:$28 sps:$4 sm:$0xff]  }
 0x3ce   :  { %2125 = vmatpush2.bf16.msra.mxu1 %v2861_v7  ;;  %v2939_v7 = vld [vmem:[%s3938_s12 + $0x18] ss:$28 sps:$4 sm:$0xff]  }
 0x3cf   :  { %2126 = vmatprep.subr.bf16.mxu1 %v2869_v8  ;;  %v2942_v8 = vld [vmem:[%s3938_s12 + $0x35c] ss:$28 sps:$4 sm:$0xff]  }
 0x3d2   :  { %2127 = vmatpush2.bf16.msra.mxu1 %v2867_v9  ;;  %v2940_v9 = vld [vmem:[%s3938_s12 + $0x358] ss:$28 sps:$4 sm:$0xff]  }
 0x3d3   :  { %2128 = vmatprep.subr.bf16.mxu1 %v2875_v10  ;;  %v2945_v10 = vld [vmem:[%s3938_s12 + $0x324] ss:$28 sps:$4 sm:$0xff]  }
 0x3d6   :  { %2129 = vmatpush2.bf16.msra.mxu1 %v2873_v11  ;;  %v2943_v11 = vld [vmem:[%s3938_s12 + $0x320] ss:$28 sps:$4 sm:$0xff]  }
 0x3d7   :  { %2130 = vmatprep.subr.bf16.mxu1 %v2881_v19  ;;  %v2948_v19 = vld [vmem:[%s3938_s12 + $0x2ec] ss:$28 sps:$4 sm:$0xff]  }
 0x3da   :  { %2131 = vmatpush2.bf16.msra.mxu1 %v2879_v12  ;;  %v2946_v12 = vld [vmem:[%s3938_s12 + $0x2e8] ss:$28 sps:$4 sm:$0xff]  }
 0x3db   :  { %2132 = vmatprep.subr.bf16.mxu1 %v2887_v13  ;;  %v2951_v13 = vld [vmem:[%s3938_s12 + $0x2b4] ss:$28 sps:$4 sm:$0xff]  }
 0x3de   :  { %2133 = vmatpush2.bf16.msra.mxu1 %v2885_v14  ;;  %v2949_v14 = vld [vmem:[%s3938_s12 + $0x2b0] ss:$28 sps:$4 sm:$0xff]  }
 0x3df   :  { %2134 = vmatprep.subr.bf16.mxu1 %v2893_v20  ;;  %v2952_v20 = vld [vmem:[%s3938_s12 + $0x278] ss:$28 sps:$4 sm:$0xff]  }
 0x3e2   :  { %2135 = vmatpush2.bf16.msra.mxu1 %v2891_v22  ;;  %v2955_v22 = vld [vmem:[%s3938_s12 + $0x240] ss:$28 sps:$4 sm:$0xff]  }
 0x3e3   :  { %2136 = vmatprep.subr.bf16.mxu1 %v2899_v24  ;;  %v2958_v24 = vld [vmem:[%s3938_s12 + $0x208] ss:$28 sps:$4 sm:$0xff]  }
 0x3e6   :  { %2137 = vmatpush2.bf16.msra.mxu1 %v2897_v26  ;;  %v2961_v26 = vld [vmem:[%s3938_s12 + $0x1d0] ss:$28 sps:$4 sm:$0xff]  }
 0x3e7   :  { %2558 = vmatprep.subr.bf16.mxu1 %v2903_v28 }
 0x469   :  { %v1313_v32 = vpop.f32.mrf.mxu1 }
 0x46a   :  { %v1314_v33 = vadd.f32 %v1313_v32, %v1229_v30 }
 0x46b   :  { %v1315_v34 = vpop.f32.mrf.mxu1 }
 0x46c   :  { %v1316_v35 = vadd.f32 %v1315_v34, %v1233_v31  ;;  %v1320_v36 = vmax.f32 %v1314_v33, 0.0 }
 0x46d   :  { %v1317_v37 = vpop.f32.mrf.mxu1 }
 0x46e   :  { %v1321_v38 = vmax.f32 %v1316_v35, 0.0  ;;  %v3771_v43 = vpack.c.bf16 %v1320_v36, %v1320_v36 }
 0x46f   :  { %v1318_v39 = vpop.f32.mrf.mxu1 }
 0x470   :  { %v1323_v40 = vpack.c.bf16 %v1321_v38, %v1321_v38 }
 0x472   :  { %2097 = vmatprep.mubr.bf16.mxu0 %v1323_v40  ;;  %2138 = vmatprep.mubr.bf16.mxu1 %v1323_v40 }
 0x473   :  { %2098 = vmatmul.mubr.bf16.vlgmr.msra.gmra.mxu0 %v3771_v43  ;;  %2139 = vmatmul.mubr.bf16.vlgmr.msra.gmra.mxu1 %v3771_v43 }
 0x474   :  { %2148 = vmatpush1.bf16.msra.mxu0 %v2900_v41  ;;  %2559 = vmatpush3.bf16.msra.mxu1 %v2904_v42 }
 0x475   :  { %2179 = vmatprep.mubr.bf16.mxu0 %v1323_v40  ;;  %2220 = vmatprep.mubr.bf16.mxu1 %v1323_v40 }
 0x476   :  { %2149 = vmatprep.subr.bf16.mxu0 %v2907_v44  ;;  %2560 = vmatprep.subr.bf16.mxu1 %v2908_v45 }
 0x478   :  { %2150 = vmatpush1.bf16.msra.mxu0 %v2905_v46  ;;  %2561 = vmatpush3.bf16.msra.mxu1 %v2909_v47 }
 0x479   :  { %2151 = vmatprep.subr.bf16.mxu0 %v2912_v48  ;;  %2562 = vmatprep.subr.bf16.mxu1 %v2913_v49 }
 0x47c   :  { %2152 = vmatpush1.bf16.msra.mxu0 %v2910_v50  ;;  %2563 = vmatpush3.bf16.msra.mxu1 %v2914_v51 }
 0x47d   :  { %2153 = vmatprep.subr.bf16.mxu0 %v2917_v52  ;;  %2564 = vmatprep.subr.bf16.mxu1 %v2918_v53 }
 0x480   :  { %2154 = vmatpush1.bf16.msra.mxu0 %v2915_v54  ;;  %2565 = vmatpush3.bf16.msra.mxu1 %v2919_v55 }
 0x481   :  { %2155 = vmatprep.subr.bf16.mxu0 %v2922_v56  ;;  %2566 = vmatprep.subr.bf16.mxu1 %v2923_v57 }
 0x484   :  { %2156 = vmatpush1.bf16.msra.mxu0 %v2920_v58  ;;  %2567 = vmatpush3.bf16.msra.mxu1 %v2924_v59 }
 0x485   :  { %2157 = vmatprep.subr.bf16.mxu0 %v2927_v60  ;;  %2568 = vmatprep.subr.bf16.mxu1 %v2928_v61 }
 0x488   :  { %2158 = vmatpush1.bf16.msra.mxu0 %v2925_v62  ;;  %2569 = vmatpush3.bf16.msra.mxu1 %v2929_v63 }
 0x489   :  { %2159 = vmatprep.subr.bf16.mxu0 %v2932_v0  ;;  %2570 = vmatprep.subr.bf16.mxu1 %v2933_v1 }
 0x48c   :  { %2160 = vmatpush1.bf16.msra.mxu0 %v2930_v2  ;;  %2571 = vmatpush3.bf16.msra.mxu1 %v2934_v3 }
 0x48d   :  { %2161 = vmatprep.subr.bf16.mxu0 %v2937_v4  ;;  %2572 = vmatprep.subr.bf16.mxu1 %v2938_v5 }
 0x490   :  { %2162 = vmatpush1.bf16.msra.mxu0 %v2935_v6  ;;  %2573 = vmatpush3.bf16.msra.mxu1 %v2939_v7 }
 0x491   :  { %2163 = vmatprep.subr.bf16.mxu0 %v2942_v8 }
 0x493   :  { %2221 = vmatmul.mubr.bf16.vlgmr.msra.gmra.mxu1 %v3771_v43 }
 0x494   :  { %2164 = vmatpush2.bf16.msra.mxu0 %v2940_v9 }
 0x495   :  { %2165 = vmatprep.subr.bf16.mxu0 %v2945_v10 }
 0x498   :  { %2166 = vmatpush2.bf16.msra.mxu0 %v2943_v11 }
 0x499   :  { %2167 = vmatprep.subr.bf16.mxu0 %v2948_v19 }
 0x49c   :  { %2168 = vmatpush2.bf16.msra.mxu0 %v2946_v12 }
 0x49d   :  { %2169 = vmatprep.subr.bf16.mxu0 %v2951_v13 }
 0x4a0   :  { %2170 = vmatpush2.bf16.msra.mxu0 %v2949_v14 }
 0x4a1   :  { %2171 = vmatprep.subr.bf16.mxu0 %v2954_v17 }
 0x4a4   :  { %2172 = vmatpush2.bf16.msra.mxu0 %v2952_v20 }
 0x4a5   :  { %2173 = vmatprep.subr.bf16.mxu0 %v2957_v21 }
 0x4a8   :  { %2174 = vmatpush2.bf16.msra.mxu0 %v2955_v22 }
 0x4a9   :  { %2175 = vmatprep.subr.bf16.mxu0 %v2960_v23 }
 0x4ac   :  { %2176 = vmatpush2.bf16.msra.mxu0 %v2958_v24 }
 0x4ad   :  { %2177 = vmatprep.subr.bf16.mxu0 %v2963_v25 }
 0x4b0   :  { %2178 = vmatpush2.bf16.msra.mxu0 %v2961_v26 }
 0x4b3   :  { %2180 = vmatmul.mubr.bf16.vlgmr.msra.gmra.mxu0 %v3771_v43 }
 0x4b4   :  { %2975 = shalt.err (!%p2972_p4)
}
 0x4b5   :  { %2251 = dma.vmem_to_hbm [thread:$0]  %s2249_s27, 128, %s3940_s14, [#allocation3]   ;;  %v1464_v27 = vsub.s32 2, %v3459_v15  ;;  %v1452_v28 = vld [vmem:[%s3939_s13] sm:$0x7f]  ;;  %v1468_v29 = vsub.s32 3, %v3459_v15 }
 0x4b6   :  { %v1457_v30 = vrot.slane %v1452_v28, %v3462_v16  ;;  %v1461_v32 = vrot.slane %v1452_v28, %v3468_v18  ;;  %v1480_v18 = vsub.s32 6, %v3459_v15  ;;  %v1472_v57 = vsub.s32 4, %v3459_v15  ;;  %s3012_s13 = smov [#allocation4]  }
 0x4b7   :  { %v1465_v31 = vrot.slane %v1452_v28, %v1464_v27  ;;  %v1469_v33 = vrot.slane %v1452_v28, %v1468_v29  ;;  %v1476_v58 = vsub.s32 5, %v3459_v15  ;;  %s2258_s14 = sshll.u32 %s3012_s13, 4  ;;  %s2259_s14 = int_to_ptr.vmem [resolvable:$true] %s2258_s14 }
 0x4b8   :  { %v1481_v50 = vrot.slane %v1452_v28, %v1480_v18  ;;  %v1473_v59 = vrot.slane %v1452_v28, %v1472_v57  ;;  %s2984_s16 = scalar_lea.vmem %s2259_s14, 896  ;;  %p2989_p6 = scmp.lt.s32.totalorder %s2259_s14, %s2259_s14 }
 0x4b9   :  { %v1477_v60 = vrot.slane %v1452_v28, %v1476_v58  ;;  %p2985_p5 = scmp.ne.s32.totalorder %s2259_s14, %s2984_s16  ;;  %p2990_p7 = scmp.lt.s32.totalorder %s2984_s16, %s2984_s16 }
 0x4bb   :  { %p2991_p8 = por %p2990_p7, %p2989_p6 }
 0x4bd   :  { %p2992_p9 = pnand %p2991_p8, %p2985_p5 }
 0x533   :  { %v2099_v34 = vpop.f32.mrf.mxu0  ;;  %v2140_v35 = vpop.f32.mrf.mxu1 }
 0x534   :  { %v2100_v36 = vadd.f32 %v2099_v34, %v1457_v30  ;;  %v2141_v37 = vadd.f32 %v2140_v35, %v1465_v31 }
 0x535   :  { %v2101_v38 = vpop.f32.mrf.mxu0  ;;  %v2142_v39 = vpop.f32.mrf.mxu1 }
 0x536   :  { %v2228_v40 = vmax.f32 %v2100_v36, 0.0  ;;  %v2230_v41 = vmax.f32 %v2141_v37, 0.0  ;;  %v2102_v42 = vadd.f32 %v2101_v38, %v1461_v32  ;;  %v2143_v43 = vadd.f32 %v2142_v39, %v1469_v33 }
 0x537   :  { %v2103_v44 = vpop.f32.mrf.mxu0  ;;  %v2144_v45 = vpop.f32.mrf.mxu1 }
 0x538   :  { %2235 = vst [vmem:[#allocation4] sm:$0xff] %v2228_v40  ;;  %2237 = vst [vmem:[#allocation4 + $0x10] sm:$0xff] %v2230_v41  ;;  %v2229_v46 = vmax.f32 %v2102_v42, 0.0  ;;  %v2231_v16 = vmax.f32 %v2143_v43, 0.0 }
 0x539   :  { %v2104_v47 = vpop.f32.mrf.mxu0  ;;  %v2145_v48 = vpop.f32.mrf.mxu1 }
 0x53a   :  { %2236 = vst [vmem:[#allocation4 + $0x8] sm:$0xff] %v2229_v46  ;;  %2238 = vst [vmem:[#allocation4 + $0x18] sm:$0xff] %v2231_v16 }
 0x553   :  { %v2574_v49 = vpop.f32.mrf.mxu1 }
 0x555   :  { %v2575_v51 = vpop.f32.mrf.mxu1 }
 0x556   :  { %v2576_v52 = vadd.f32 %v2575_v51, %v2574_v49 }
 0x557   :  { %v2577_v53 = vpop.f32.mrf.mxu1 }
 0x558   :  { %v2223_v54 = vadd.f32 %v2576_v52, %v1481_v50 }
 0x559   :  { %v2578_v55 = vpop.f32.mrf.mxu1 }
 0x55a   :  { %v2234_v56 = vmax.f32 %v2223_v54, 0.0 }
 0x55c   :  { %2241 = vst.msk [vmem:[#allocation4 + $0x30] sm:$0xff] %vm666_vm0, %v2234_v56 }
 0x573   :  { %v2181_v61 = vpop.f32.mrf.mxu0 }
 0x574   :  { %v2182_v62 = vadd.f32 %v2181_v61, %v1473_v59 }
 0x575   :  { %v2183_v63 = vpop.f32.mrf.mxu0 }
 0x576   :  { %v2232_v0 = vmax.f32 %v2182_v62, 0.0  ;;  %v2184_v1 = vadd.f32 %v2183_v63, %v1477_v60 }
 0x577   :  { %v2185_v2 = vpop.f32.mrf.mxu0 }
 0x578   :  { %2239 = vst [vmem:[#allocation4 + $0x20] sm:$0xff] %v2232_v0  ;;  %v2233_v3 = vmax.f32 %v2184_v1, 0.0 }
 0x579   :  { %v2186_v4 = vpop.f32.mrf.mxu0 }
 0x57a   :  { %2240 = vst [vmem:[#allocation4 + $0x28] sm:$0xff] %v2233_v3 }
 0x57b   :  { %2995 = shalt.err (!%p2992_p9)
}
 0x57c   :  { %2261 = dma.vmem_to_hbm [thread:$0]  %s2259_s14, 896, %s3941_s15, [#allocation5]  }
 0x57d   :  { %3004 = dma.done.wait [#allocation3], 128  }
 0x57e   :  { %3005 = vsyncadd [#allocation3], 4294967168 }
 0x57f   :  { %3006 = dma.done.wait [#allocation5], 896  }
 0x580   :  { %3007 = vsyncadd [#allocation5], 4294966400 }
 0x581   :  { %2268 = vsyncpa [#allocation3], 1 }
 0x582   :  { %2269 = vsyncpa [#allocation5], 1 }

</bundles_post_ra>
